<compile_context>
chip_gen: v7x
topology: tpu7x:2x2x1
jax: 0.10.0
libtpu: 0.0.40
codegen_flags: <defaults>
</compile_context>

<pallas_src>
import functools

import jax
import jax.numpy as jnp
from jax.experimental import pallas as pl
from jax.experimental.pallas import tpu as pltpu


def _round_up(x, m):
    return (x + m - 1) // m * m


def _leaky_relu(x, slope=0.2):
    return jnp.where(x > 0, x, slope * x)


def _has_bf16_vpu():
    """bf16 VALU exists on v6e / v7x; v5e (and older) keep the f32 elementwise path."""
    try:
        kind = jax.devices()[0].device_kind.lower()
    except Exception:
        return False
    return any(tag in kind for tag in ("v6", "v7", "tpu7", "7x"))


def discriminator_kernel(x_ref, w1_ref, b1_ref, w2_ref, b2_ref, w3_ref, b3_ref,
                         o_ref, *, bf16_elementwise):
    """One batch tile of the MLP.

    x:  (TB, D)    f32  (cast to bf16 on the VPU; free slot under MXU-bound kernel)
    w1: (D, 512)   bf16     b1: (1, 512) f32
    w2: (512, 256) bf16     b2: (1, 256) f32
    w3: (1, 256)   f32      b3: (1,)     f32 (SMEM scalar)
    o:  (1, TB)    f32  -- lane-dense logits for this batch tile
    """
    # Layer 1: MXU, bf16 inputs / f32 accumulation.
    x = x_ref[...].astype(jnp.bfloat16)
    h1 = jnp.dot(x, w1_ref[...], preferred_element_type=jnp.float32)
    if bf16_elementwise:
        # v6e/v7x: bf16 VALU -> halve the (TB, 512) intermediate, no extra cast
        # needed before the layer-2 dot.
        h1 = _leaky_relu(h1.astype(jnp.bfloat16) + b1_ref[...].astype(jnp.bfloat16))
    else:
        # v5e: no bf16 VPU -> keep elementwise math f32, cast only at MXU input.
        h1 = _leaky_relu(h1 + b1_ref[...]).astype(jnp.bfloat16)

    # Layer 2: MXU, bf16 in / f32 accumulate; bias + LeakyReLU in f32.
    h2 = jnp.dot(h1, w2_ref[...], preferred_element_type=jnp.float32)
    h2 = _leaky_relu(h2 + b2_ref[...])

    # Layer 3 (out_features = 1): VPU multiply + cross-lane reduce (XLU), not MXU.
    logits = jnp.sum(h2 * w3_ref[...], axis=-1) + b3_ref[0]          # (TB,)
    o_ref[...] = logits.reshape(1, -1).astype(o_ref.dtype)


def pack_params(params):
    """One-time weight packing (call at init / after each optimizer step).

    Removes every per-forward cast/reshape/pad HBM pass over the weights.
    """
    w1, b1, w2, b2, w3, b3 = params
    return (
        jnp.asarray(w1, jnp.bfloat16),                    # (D, 512)   bf16
        jnp.asarray(b1, jnp.float32).reshape(1, -1),      # (1, 512)   f32
        jnp.asarray(w2, jnp.bfloat16),                    # (512, 256) bf16
        jnp.asarray(b2, jnp.float32).reshape(1, -1),      # (1, 256)   f32
        jnp.asarray(w3, jnp.float32).reshape(1, -1),      # (1, 256)   f32
        jnp.asarray(b3, jnp.float32).reshape(-1),         # (1,)       f32 (SMEM)
    )


def _pick_batch_tile(B, block_b):
    tb = min(block_b, _round_up(B, 8))
    # Keep >= 2 grid steps for large batches so the "parallel" batch axis can
    # shard across both TensorCores on v7x; the extra ~0.35us step is noise on
    # the single-TC v5e/v6e.
    if B >= 256 and pl.cdiv(B, tb) < 2:
        tb = _round_up(pl.cdiv(B, 2), 128)
    return tb


def discriminator_forward(img, packed_params, *, block_b=1024, bf16_elementwise=None):
    """img: (B, C, H, W) float32 -> validity: (B, 1) float32."""
    w1b, b1r, w2b, b2r, w3r, b3r = packed_params
    B = img.shape[0]
    D, H1 = w1b.shape
    H2 = w2b.shape[1]

    if bf16_elementwise is None:
        bf16_elementwise = _has_bf16_vpu()

    # Row-major flatten == torch img.view(B, -1).  Stays f32: the bf16 cast is
    # done on the VPU inside the kernel, so activations make exactly one HBM
    # read (no wrapper-side cast/pad round trip).
    x = img.reshape(B, -1)
    assert x.shape[1] == D, (x.shape, D)

    TB = _pick_batch_tile(B, block_b)
    Bp = _round_up(B, TB)
    if Bp != B:
        x = jnp.pad(x, ((0, Bp - B), (0, 0)))

    kernel = functools.partial(discriminator_kernel,
                               bf16_elementwise=bf16_elementwise)

    cost = pl.CostEstimate(
        flops=2 * Bp * (D * H1 + H1 * H2 + H2),
        transcendentals=0,
        bytes_accessed=(Bp * D * 4                       # f32 activation stream
                        + 2 * (D * H1 + H1 * H2)         # bf16 weights
                        + 4 * (H1 + 2 * H2 + 1)          # biases + w3 row
                        + Bp * 4),                       # logits out
    )

    def build(resident_mode):
        extra = {} if resident_mode is None else {"pipeline_mode": resident_mode}
        grid_spec = pltpu.PrefetchScalarGridSpec(
            num_scalar_prefetch=0,
            grid=(Bp // TB,),
            in_specs=[
                pl.BlockSpec((TB, D), lambda i: (i, 0)),            # x (streamed)
                pl.BlockSpec((D, H1), lambda i: (0, 0), **extra),   # w1 (resident)
                pl.BlockSpec((1, H1), lambda i: (0, 0), **extra),   # b1
                pl.BlockSpec((H1, H2), lambda i: (0, 0), **extra),  # w2 (resident)
                pl.BlockSpec((1, H2), lambda i: (0, 0), **extra),   # b2
                pl.BlockSpec((1, H2), lambda i: (0, 0), **extra),   # w3 row
                pl.BlockSpec(memory_space=pltpu.MemorySpace.SMEM),  # b3 scalar
            ],
            out_specs=pl.BlockSpec((1, TB), lambda i: (0, i)),      # lane-dense logits
        )
        return pl.pallas_call(
            kernel,
            out_shape=jax.ShapeDtypeStruct((1, Bp), jnp.float32),
            grid_spec=grid_spec,
            compiler_params=pltpu.CompilerParams(
                dimension_semantics=("parallel",)),
            cost_estimate=cost,
        )

    args = (x, w1b, b1r, w2b, b2r, w3r, b3r)
    try:
        # Resident operands (constant index_map) only need a single buffer.
        out_row = build(pl.Buffered(1))(*args)
    except Exception:
        # Fallback: default double-buffering (footprint is a few MiB either way).
        out_row = build(None)(*args)

    return out_row.reshape(-1)[:B].reshape(B, 1)


def init_params(key, in_dim, h1=512, h2=256, out_dim=1):
    """Deterministic synthetic init (PyTorch-Linear-like uniform ranges)."""
    ks = jax.random.split(key, 6)

    def lin(kw, kb, fan_in, fan_out):
        bound = 1.0 / float(jnp.sqrt(fan_in))
        w = jax.random.uniform(kw, (fan_in, fan_out), jnp.float32, -bound, bound)
        b = jax.random.uniform(kb, (fan_out,), jnp.float32, -bound, bound)
        return w, b

    w1, b1 = lin(ks[0], ks[1], in_dim, h1)
    w2, b2 = lin(ks[2], ks[3], h1, h2)
    w3, b3 = lin(ks[4], ks[5], h2, out_dim)
    return (w1, b1, w2, b2, w3, b3)


def reference_forward_matched(img, params, bf16_elementwise):
    """Pure-JAX reference matching the kernel's precision path exactly."""
    w1, b1, w2, b2, w3, b3 = params
    x = img.reshape(img.shape[0], -1).astype(jnp.bfloat16)
    h1 = jnp.dot(x, w1.astype(jnp.bfloat16), preferred_element_type=jnp.float32)
    if bf16_elementwise:
        h1 = h1.astype(jnp.bfloat16) + b1.reshape(1, -1).astype(jnp.bfloat16)
        h1 = jnp.where(h1 > 0, h1, 0.2 * h1)
    else:
        h1 = h1 + b1.reshape(1, -1)
        h1 = jnp.where(h1 > 0, h1, 0.2 * h1).astype(jnp.bfloat16)
    h2 = jnp.dot(h1, w2.astype(jnp.bfloat16), preferred_element_type=jnp.float32)
    h2 = h2 + b2.reshape(1, -1)
    h2 = jnp.where(h2 > 0, h2, 0.2 * h2)
    return (jnp.sum(h2 * w3.reshape(1, -1), axis=-1, keepdims=True)
            + b3.reshape(1, -1))


def reference_forward_f32(img, params):
    """Full-precision reference of the original PyTorch semantics."""
    w1, b1, w2, b2, w3, b3 = params
    x = img.reshape(img.shape[0], -1)
    h1 = x @ w1 + b1.reshape(1, -1)
    h1 = jnp.where(h1 > 0, h1, 0.2 * h1)
    h2 = h1 @ w2 + b2.reshape(1, -1)
    h2 = jnp.where(h2 > 0, h2, 0.2 * h2)
    return h2 @ w3 + b3.reshape(1, -1)


if __name__ == "__main__":
    # MNIST-like (small) shapes: batch=2, channels=1, img_size=28 -> D=784.
    B, C, H, W = 2, 1, 28, 28
    key = jax.random.PRNGKey(0)
    k_img, k_par, k_big = jax.random.split(key, 3)

    img = jax.random.normal(k_img, (B, C, H, W), jnp.float32)
    params = init_params(k_par, C * H * W)
    packed = pack_params(params)          # one-time packing (per param update)
    bf16_elem = _has_bf16_vpu()

    validity = jax.block_until_ready(discriminator_forward(img, packed))
    assert validity.shape == (B, 1)

    ref_m = reference_forward_matched(img, params, bf16_elem)
    ref_f = reference_forward_f32(img, params)
    assert jnp.allclose(validity, ref_m, atol=5e-3, rtol=5e-3), (validity, ref_m)
    assert jnp.allclose(validity, ref_f, atol=5e-2, rtol=5e-2), (validity, ref_f)

    # Multi-tile, pipelined path: B=512 -> >= 2 grid steps (megacore on v7x).
    B_big = 512
    img_big = jax.random.normal(k_big, (B_big, C, H, W), jnp.float32)
    validity_big = jax.block_until_ready(discriminator_forward(img_big, packed))
    ref_big = reference_forward_matched(img_big, params, bf16_elem)
    assert validity_big.shape == (B_big, 1)
    assert jnp.allclose(validity_big, ref_big, atol=5e-3, rtol=5e-3)

    print("KERNEL_OK")
</pallas_src>

<mosaic_0001>
module attributes {stable_mosaic.version = 11 : i64} {
  func.func @discriminator_kernel(%arg0: i32, %arg1: memref<8x784xf32, #tpu.memory_space<vmem>>, %arg2: memref<784x512xbf16, #tpu.memory_space<vmem>>, %arg3: memref<1x512xf32, #tpu.memory_space<vmem>>, %arg4: memref<512x256xbf16, #tpu.memory_space<vmem>>, %arg5: memref<1x256xf32, #tpu.memory_space<vmem>>, %arg6: memref<1x256xf32, #tpu.memory_space<vmem>>, %arg7: memref<1xf32, #tpu.memory_space<smem>>, %arg8: memref<1x8xf32, #tpu.memory_space<vmem>>) attributes {dimension_semantics = [#tpu.dimension_semantics<parallel>], iteration_bounds = array<i64: 1>, scalar_prefetch = 0 : i64, scratch_operands = 0 : i64, tpu.core_type = #tpu.core_type<tc>, window_params = [{transform_indices = @transform_0, window_bounds = array<i64: 8, 784>}, {pipeline_mode = #tpu.pipeline_mode<synchronous>, transform_indices = @transform_1, window_bounds = array<i64: 784, 512>}, {pipeline_mode = #tpu.pipeline_mode<synchronous>, transform_indices = @transform_2, window_bounds = array<i64: 1, 512>}, {pipeline_mode = #tpu.pipeline_mode<synchronous>, transform_indices = @transform_3, window_bounds = array<i64: 512, 256>}, {pipeline_mode = #tpu.pipeline_mode<synchronous>, transform_indices = @transform_4, window_bounds = array<i64: 1, 256>}, {pipeline_mode = #tpu.pipeline_mode<synchronous>, transform_indices = @transform_5, window_bounds = array<i64: 1, 256>}, {transform_indices = @transform_6, window_bounds = array<i64: 1>}, {transform_indices = @transform_7, window_bounds = array<i64: 1, 8>}]} {
    %c0 = arith.constant 0 : index
    %c0_0 = arith.constant 0 : index
    %0 = vector.load %arg1[%c0, %c0_0] : memref<8x784xf32, #tpu.memory_space<vmem>>, vector<8x784xf32>
    %1 = arith.truncf %0 : vector<8x784xf32> to vector<8x784xbf16>
    %c0_1 = arith.constant 0 : index
    %c0_2 = arith.constant 0 : index
    %2 = vector.load %arg2[%c0_1, %c0_2] : memref<784x512xbf16, #tpu.memory_space<vmem>>, vector<784x512xbf16>
    %cst = arith.constant dense<0.000000e+00> : vector<8x512xf32>
    %3 = tpu.matmul %1, %2, %cst {dimension_numbers = #tpu.dot_dimension_numbers<[1], [0], [0], [1], [0, 0, 1, 1], [], []>} : vector<8x784xbf16>, vector<784x512xbf16>, vector<8x512xf32> -> vector<8x512xf32>
    %c0_3 = arith.constant 0 : index
    %c0_4 = arith.constant 0 : index
    %4 = vector.load %arg3[%c0_3, %c0_4] : memref<1x512xf32, #tpu.memory_space<vmem>>, vector<1x512xf32>
    %5 = vector.broadcast %4 : vector<1x512xf32> to vector<8x512xf32>
    %6 = arith.addf %3, %5 : vector<8x512xf32>
    %cst_5 = arith.constant 0.000000e+00 : f32
    %7 = vector.broadcast %cst_5 : f32 to vector<8x512xf32>
    %8 = arith.cmpf ogt, %6, %7 : vector<8x512xf32>
    %cst_6 = arith.constant 2.000000e-01 : f32
    %9 = vector.broadcast %cst_6 : f32 to vector<8x512xf32>
    %10 = arith.mulf %9, %6 : vector<8x512xf32>
    %11 = arith.select %8, %6, %10 : vector<8x512xi1>, vector<8x512xf32>
    %12 = arith.truncf %11 : vector<8x512xf32> to vector<8x512xbf16>
    %c0_7 = arith.constant 0 : index
    %c0_8 = arith.constant 0 : index
    %13 = vector.load %arg4[%c0_7, %c0_8] : memref<512x256xbf16, #tpu.memory_space<vmem>>, vector<512x256xbf16>
    %cst_9 = arith.constant dense<0.000000e+00> : vector<8x256xf32>
    %14 = tpu.matmul %12, %13, %cst_9 {dimension_numbers = #tpu.dot_dimension_numbers<[1], [0], [0], [1], [0, 0, 1, 1], [], []>} : vector<8x512xbf16>, vector<512x256xbf16>, vector<8x256xf32> -> vector<8x256xf32>
    %c0_10 = arith.constant 0 : index
    %c0_11 = arith.constant 0 : index
    %15 = vector.load %arg5[%c0_10, %c0_11] : memref<1x256xf32, #tpu.memory_space<vmem>>, vector<1x256xf32>
    %16 = vector.broadcast %15 : vector<1x256xf32> to vector<8x256xf32>
    %17 = arith.addf %14, %16 : vector<8x256xf32>
    %cst_12 = arith.constant 0.000000e+00 : f32
    %18 = vector.broadcast %cst_12 : f32 to vector<8x256xf32>
    %19 = arith.cmpf ogt, %17, %18 : vector<8x256xf32>
    %cst_13 = arith.constant 2.000000e-01 : f32
    %20 = vector.broadcast %cst_13 : f32 to vector<8x256xf32>
    %21 = arith.mulf %20, %17 : vector<8x256xf32>
    %22 = arith.select %19, %17, %21 : vector<8x256xi1>, vector<8x256xf32>
    %c0_14 = arith.constant 0 : index
    %c0_15 = arith.constant 0 : index
    %23 = vector.load %arg6[%c0_14, %c0_15] : memref<1x256xf32, #tpu.memory_space<vmem>>, vector<1x256xf32>
    %24 = vector.broadcast %23 : vector<1x256xf32> to vector<8x256xf32>
    %25 = arith.mulf %22, %24 : vector<8x256xf32>
    %cst_16 = arith.constant dense<0.000000e+00> : vector<8xf32>
    %26 = vector.multi_reduction <add>, %25, %cst_16 [1] : vector<8x256xf32> to vector<8xf32>
    %c0_17 = arith.constant 0 : index
    %27 = memref.load %arg7[%c0_17] : memref<1xf32, #tpu.memory_space<smem>>
    %28 = vector.broadcast %27 : f32 to vector<8xf32>
    %29 = arith.addf %26, %28 : vector<8xf32>
    %30 = vector.shape_cast %29 : vector<8xf32> to vector<1x8xf32>
    %c0_18 = arith.constant 0 : index
    %c0_19 = arith.constant 0 : index
    %31 = vector.load %arg8[%c0_18, %c0_19] : memref<1x8xf32, #tpu.memory_space<vmem>>, vector<1x8xf32>
    tpu.vector_store %arg8[%c0_18, %c0_19], %30 {strides = array<i32>} : memref<1x8xf32, #tpu.memory_space<vmem>>, vector<1x8xf32>,
    return
  }
  func.func @transform_0(%arg0: i32) -> (i32, i32) {
    %c0_i32 = arith.constant 0 : i32
    %c0_i32_0 = arith.constant 0 : i32
    return %arg0, %c0_i32 : i32, i32
  }
  func.func @transform_1(%arg0: i32) -> (i32, i32) {
    %c0_i32 = arith.constant 0 : i32
    %c0_i32_0 = arith.constant 0 : i32
    %c0_i32_1 = arith.constant 0 : i32
    return %c0_i32, %c0_i32_0 : i32, i32
  }
  func.func @transform_2(%arg0: i32) -> (i32, i32) {
    %c0_i32 = arith.constant 0 : i32
    %c0_i32_0 = arith.constant 0 : i32
    %c0_i32_1 = arith.constant 0 : i32
    return %c0_i32, %c0_i32_0 : i32, i32
  }
  func.func @transform_3(%arg0: i32) -> (i32, i32) {
    %c0_i32 = arith.constant 0 : i32
    %c0_i32_0 = arith.constant 0 : i32
    %c0_i32_1 = arith.constant 0 : i32
    return %c0_i32, %c0_i32_0 : i32, i32
  }
  func.func @transform_4(%arg0: i32) -> (i32, i32) {
    %c0_i32 = arith.constant 0 : i32
    %c0_i32_0 = arith.constant 0 : i32
    %c0_i32_1 = arith.constant 0 : i32
    return %c0_i32, %c0_i32_0 : i32, i32
  }
  func.func @transform_5(%arg0: i32) -> (i32, i32) {
    %c0_i32 = arith.constant 0 : i32
    %c0_i32_0 = arith.constant 0 : i32
    %c0_i32_1 = arith.constant 0 : i32
    return %c0_i32, %c0_i32_0 : i32, i32
  }
  func.func @transform_6(%arg0: i32) -> i32 {
    %c0_i32 = arith.constant 0 : i32
    %c0_i32_0 = arith.constant 0 : i32
    return %c0_i32 : i32
  }
  func.func @transform_7(%arg0: i32) -> (i32, i32) {
    %c0_i32 = arith.constant 0 : i32
    %c0_i32_0 = arith.constant 0 : i32
    return %c0_i32, %arg0 : i32, i32
  }
}

module attributes {stable_mosaic.version = 11 : i64} {
  func.func @discriminator_kernel(%arg0: i32, %arg1: memref<8x784xf32, #tpu.memory_space<vmem>>, %arg2: memref<784x512xbf16, #tpu.memory_space<vmem>>, %arg3: memref<1x512xf32, #tpu.memory_space<vmem>>, %arg4: memref<512x256xbf16, #tpu.memory_space<vmem>>, %arg5: memref<1x256xf32, #tpu.memory_space<vmem>>, %arg6: memref<1x256xf32, #tpu.memory_space<vmem>>, %arg7: memref<1xf32, #tpu.memory_space<smem>>, %arg8: memref<1x8xf32, #tpu.memory_space<vmem>>) attributes {dimension_semantics = [#tpu.dimension_semantics<parallel>], iteration_bounds = array<i64: 1>, scalar_prefetch = 0 : i64, scratch_operands = 0 : i64, tpu.core_type = #tpu.core_type<tc>, window_params = [{transform_indices = @transform_0, window_bounds = array<i64: 8, 784>}, {pipeline_mode = #tpu.pipeline_mode<synchronous>, transform_indices = @transform_1, window_bounds = array<i64: 784, 512>}, {pipeline_mode = #tpu.pipeline_mode<synchronous>, transform_indices = @transform_2, window_bounds = array<i64: 1, 512>}, {pipeline_mode = #tpu.pipeline_mode<synchronous>, transform_indices = @transform_3, window_bounds = array<i64: 512, 256>}, {pipeline_mode = #tpu.pipeline_mode<synchronous>, transform_indices = @transform_4, window_bounds = array<i64: 1, 256>}, {pipeline_mode = #tpu.pipeline_mode<synchronous>, transform_indices = @transform_5, window_bounds = array<i64: 1, 256>}, {transform_indices = @transform_6, window_bounds = array<i64: 1>}, {transform_indices = @transform_7, window_bounds = array<i64: 1, 8>}]} {
    %c0 = arith.constant 0 : index
    %c0_0 = arith.constant 0 : index
    %0 = vector.load %arg1[%c0, %c0_0] : memref<8x784xf32, #tpu.memory_space<vmem>>, vector<8x784xf32>
    %1 = arith.truncf %0 : vector<8x784xf32> to vector<8x784xbf16>
    %c0_1 = arith.constant 0 : index
    %c0_2 = arith.constant 0 : index
    %2 = vector.load %arg2[%c0_1, %c0_2] : memref<784x512xbf16, #tpu.memory_space<vmem>>, vector<784x512xbf16>
    %cst = arith.constant dense<0.000000e+00> : vector<8x512xf32>
    %3 = tpu.matmul %1, %2, %cst {dimension_numbers = #tpu.dot_dimension_numbers<[1], [0], [0], [1], [0, 0, 1, 1], [], []>} : vector<8x784xbf16>, vector<784x512xbf16>, vector<8x512xf32> -> vector<8x512xf32>
    %c0_3 = arith.constant 0 : index
    %c0_4 = arith.constant 0 : index
    %4 = vector.load %arg3[%c0_3, %c0_4] : memref<1x512xf32, #tpu.memory_space<vmem>>, vector<1x512xf32>
    %5 = vector.broadcast %4 : vector<1x512xf32> to vector<8x512xf32>
    %6 = arith.addf %3, %5 : vector<8x512xf32>
    %cst_5 = arith.constant 0.000000e+00 : f32
    %7 = vector.broadcast %cst_5 : f32 to vector<8x512xf32>
    %8 = arith.cmpf ogt, %6, %7 : vector<8x512xf32>
    %cst_6 = arith.constant 2.000000e-01 : f32
    %9 = vector.broadcast %cst_6 : f32 to vector<8x512xf32>
    %10 = arith.mulf %9, %6 : vector<8x512xf32>
    %11 = arith.select %8, %6, %10 : vector<8x512xi1>, vector<8x512xf32>
    %12 = arith.truncf %11 : vector<8x512xf32> to vector<8x512xbf16>
    %c0_7 = arith.constant 0 : index
    %c0_8 = arith.constant 0 : index
    %13 = vector.load %arg4[%c0_7, %c0_8] : memref<512x256xbf16, #tpu.memory_space<vmem>>, vector<512x256xbf16>
    %cst_9 = arith.constant dense<0.000000e+00> : vector<8x256xf32>
    %14 = tpu.matmul %12, %13, %cst_9 {dimension_numbers = #tpu.dot_dimension_numbers<[1], [0], [0], [1], [0, 0, 1, 1], [], []>} : vector<8x512xbf16>, vector<512x256xbf16>, vector<8x256xf32> -> vector<8x256xf32>
    %c0_10 = arith.constant 0 : index
    %c0_11 = arith.constant 0 : index
    %15 = vector.load %arg5[%c0_10, %c0_11] : memref<1x256xf32, #tpu.memory_space<vmem>>, vector<1x256xf32>
    %16 = vector.broadcast %15 : vector<1x256xf32> to vector<8x256xf32>
    %17 = arith.addf %14, %16 : vector<8x256xf32>
    %cst_12 = arith.constant 0.000000e+00 : f32
    %18 = vector.broadcast %cst_12 : f32 to vector<8x256xf32>
    %19 = arith.cmpf ogt, %17, %18 : vector<8x256xf32>
    %cst_13 = arith.constant 2.000000e-01 : f32
    %20 = vector.broadcast %cst_13 : f32 to vector<8x256xf32>
    %21 = arith.mulf %20, %17 : vector<8x256xf32>
    %22 = arith.select %19, %17, %21 : vector<8x256xi1>, vector<8x256xf32>
    %c0_14 = arith.constant 0 : index
    %c0_15 = arith.constant 0 : index
    %23 = vector.load %arg6[%c0_14, %c0_15] : memref<1x256xf32, #tpu.memory_space<vmem>>, vector<1x256xf32>
    %24 = vector.broadcast %23 : vector<1x256xf32> to vector<8x256xf32>
    %25 = arith.mulf %22, %24 : vector<8x256xf32>
    %cst_16 = arith.constant dense<0.000000e+00> : vector<8xf32>
    %26 = vector.multi_reduction <add>, %25, %cst_16 [1] : vector<8x256xf32> to vector<8xf32>
    %c0_17 = arith.constant 0 : index
    %27 = memref.load %arg7[%c0_17] : memref<1xf32, #tpu.memory_space<smem>>
    %28 = vector.broadcast %27 : f32 to vector<8xf32>
    %29 = arith.addf %26, %28 : vector<8xf32>
    %30 = vector.shape_cast %29 : vector<8xf32> to vector<1x8xf32>
    %c0_18 = arith.constant 0 : index
    %c0_19 = arith.constant 0 : index
    %31 = vector.load %arg8[%c0_18, %c0_19] : memref<1x8xf32, #tpu.memory_space<vmem>>, vector<1x8xf32>
    tpu.vector_store %arg8[%c0_18, %c0_19], %30 {strides = array<i32>} : memref<1x8xf32, #tpu.memory_space<vmem>>, vector<1x8xf32>,
    return
  }
  func.func @transform_0(%arg0: i32) -> (i32, i32) {
    %c0_i32 = arith.constant 0 : i32
    %c0_i32_0 = arith.constant 0 : i32
    return %arg0, %c0_i32 : i32, i32
  }
  func.func @transform_1(%arg0: i32) -> (i32, i32) {
    %c0_i32 = arith.constant 0 : i32
    %c0_i32_0 = arith.constant 0 : i32
    %c0_i32_1 = arith.constant 0 : i32
    return %c0_i32, %c0_i32_0 : i32, i32
  }
  func.func @transform_2(%arg0: i32) -> (i32, i32) {
    %c0_i32 = arith.constant 0 : i32
    %c0_i32_0 = arith.constant 0 : i32
    %c0_i32_1 = arith.constant 0 : i32
    return %c0_i32, %c0_i32_0 : i32, i32
  }
  func.func @transform_3(%arg0: i32) -> (i32, i32) {
    %c0_i32 = arith.constant 0 : i32
    %c0_i32_0 = arith.constant 0 : i32
    %c0_i32_1 = arith.constant 0 : i32
    return %c0_i32, %c0_i32_0 : i32, i32
  }
  func.func @transform_4(%arg0: i32) -> (i32, i32) {
    %c0_i32 = arith.constant 0 : i32
    %c0_i32_0 = arith.constant 0 : i32
    %c0_i32_1 = arith.constant 0 : i32
    return %c0_i32, %c0_i32_0 : i32, i32
  }
  func.func @transform_5(%arg0: i32) -> (i32, i32) {
    %c0_i32 = arith.constant 0 : i32
    %c0_i32_0 = arith.constant 0 : i32
    %c0_i32_1 = arith.constant 0 : i32
    return %c0_i32, %c0_i32_0 : i32, i32
  }
  func.func @transform_6(%arg0: i32) -> i32 {
    %c0_i32 = arith.constant 0 : i32
    %c0_i32_0 = arith.constant 0 : i32
    return %c0_i32 : i32
  }
  func.func @transform_7(%arg0: i32) -> (i32, i32) {
    %c0_i32 = arith.constant 0 : i32
    %c0_i32_0 = arith.constant 0 : i32
    return %c0_i32, %arg0 : i32, i32
  }
}

</mosaic_0001>

<bundles_post_ra>
// kernel: tpu_custom_call.1
= control target key start
LH: loop header
LB: loop body
LE: loop exit
PB: predicated region body
PF: predicated region fallthrough
CT: control target
= control target key end

     0   :  { %13 = vsyncpa [#allocation4], 0  ;;  %s3111_s0 = inlined_call_operand.hbm [shape: f32[8,784], index: 0, kind: input, shape index: {}]   ;;  %s3112_s1 = inlined_call_operand.hbm [shape: bf16[784,512], index: 1, kind: input, shape index: {}]   ;;  %s3113_s2 = inlined_call_operand.vmem [shape: f32[1,512], index: 2, kind: input, shape index: {}]   ;;  %s3114_s3 = inlined_call_operand.hbm [shape: bf16[512,256], index: 3, kind: input, shape index: {}]   ;;  %s3115_s4 = inlined_call_operand.vmem [shape: f32[1,256], index: 4, kind: input, shape index: {}]   ;;  %s3116_s5 = inlined_call_operand.vmem [shape: f32[1,256], index: 5, kind: input, shape index: {}]   ;;  %s3117_s6 = inlined_call_operand.<no memory space> [shape: f32[1], index: 6, kind: input, shape index: {}]   ;;  %s3118_s7 = inlined_call_operand.hbm [shape: f32[1,8], index: 7, kind: output, shape index: {}]  }
   0x1   :  { %14 = vsyncpa [#allocation7], 0 }
   0x2   :  { %15 = vsyncpa [#allocation5], 0  ;;  %s2945_s24 = smov [#allocation6]   ;;  %s2851_s28 = scalar_lea.hbm %s3112_s1, 25088 }
   0x3   :  { %s31_s25 = sshll.u32 %s2945_s24, 4  ;;  %p2852_p0 = scmp.ne.s32.totalorder %s3112_s1, %s2851_s28  ;;  %s32_s25 = int_to_ptr.vmem [resolvable:$true] %s31_s25 }
   0x4   :  { %p2855_p1 = scmp.lt.u32.totalorder %s2851_s28, %s3112_s1 }
   0x6   :  { %p2857_p2 = pnand %p2855_p1, %p2852_p0 }
   0x8   :  { %2860 = shalt.err (!%p2857_p2)
}
   0x9   :  { %s2861_s10 = scalar_lea.vmem %s32_s25, 25088  ;;  %p2866_p4 = scmp.lt.s32.totalorder %s32_s25, %s32_s25 }
   0xa   :  { %p2862_p3 = scmp.ne.s32.totalorder %s32_s25, %s2861_s10  ;;  %p2867_p5 = scmp.lt.s32.totalorder %s2861_s10, %s2861_s10 }
   0xc   :  { %p2868_p6 = por %p2867_p5, %p2866_p4 }
   0xe   :  { %p2869_p7 = pnand %p2868_p6, %p2862_p3 }
  0x10   :  { %2872 = shalt.err (!%p2869_p7)
}
  0x11   :  { %s2946_s11 = smov 256   ;;  %s2947_s12 = smov 16  }
  0x12   :  { %37 = dma.hbm_to_vmem [thread:$0]  %s3112_s1, 25088, %s32_s25, [#allocation7], %s2946_s11, %s2946_s11, %s2947_s12  }
  0x13   :  { %s2948_s15 = smov [#allocation3]   ;;  %s2949_s17 = smov [#allocation8]  }
  0x14   :  { %s22_s16 = sshll.u32 %s2948_s15, 4  ;;  %s45_s18 = sshll.u32 %s2949_s17, 4  ;;  %s23_s16 = int_to_ptr.vmem [resolvable:$true] %s22_s16  ;;  %s46_s18 = int_to_ptr.vmem [resolvable:$true] %s45_s18 }
  0x15   :  { %s2873_s21 = scalar_lea.hbm %s3111_s0, 896 }
  0x16   :  { %p2874_p8 = scmp.ne.s32.totalorder %s3111_s0, %s2873_s21  ;;  %p2877_p9 = scmp.lt.u32.totalorder %s2873_s21, %s3111_s0 }
  0x18   :  { %p2879_p10 = pnand %p2877_p9, %p2874_p8 }
  0x1a   :  { %2882 = shalt.err (!%p2879_p10)
}
  0x1b   :  { %s2883_s1 = scalar_lea.vmem %s23_s16, 896  ;;  %p2888_p12 = scmp.lt.s32.totalorder %s23_s16, %s23_s16 }
  0x1c   :  { %p2884_p11 = scmp.ne.s32.totalorder %s23_s16, %s2883_s1  ;;  %p2889_p13 = scmp.lt.s32.totalorder %s2883_s1, %s2883_s1 }
  0x1e   :  { %p2890_p0 = por %p2889_p13, %p2888_p12 }
  0x20   :  { %p2891_p1 = pnand %p2890_p0, %p2884_p11 }
  0x22   :  { %2894 = shalt.err (!%p2891_p1)
}
  0x23   :  { %25 = dma.hbm_to_vmem [thread:$0]  %s3111_s0, 896, %s23_s16, [#allocation4]  }
  0x24   :  { %s2895_s30 = scalar_lea.hbm %s3114_s3, 8192 }
  0x25   :  { %p2896_p2 = scmp.ne.s32.totalorder %s3114_s3, %s2895_s30  ;;  %p2899_p3 = scmp.lt.u32.totalorder %s2895_s30, %s3114_s3 }
  0x27   :  { %p2901_p4 = pnand %p2899_p3, %p2896_p2 }
  0x29   :  { %2904 = shalt.err (!%p2901_p4)
}
  0x2a   :  { %s2905_s12 = scalar_lea.vmem %s46_s18, 8192  ;;  %p2910_p6 = scmp.lt.s32.totalorder %s46_s18, %s46_s18 }
  0x2b   :  { %p2906_p5 = scmp.ne.s32.totalorder %s46_s18, %s2905_s12  ;;  %p2911_p7 = scmp.lt.s32.totalorder %s2905_s12, %s2905_s12 }
  0x2d   :  { %p2912_p8 = por %p2911_p7, %p2910_p6 }
  0x2f   :  { %p2913_p9 = pnand %p2912_p8, %p2906_p5 }
  0x31   :  { %2916 = shalt.err (!%p2913_p9)
}
  0x32   :  { %s2950_s0 = smov 128   ;;  %s2951_s13 = smov 8  }
  0x33   :  { %51 = dma.hbm_to_vmem [thread:$0]  %s3114_s3, 8192, %s46_s18, [#allocation7], %s2950_s0, %s2950_s0, %s2951_s13  }
  0x34   :  { %2939 = dma.done.wait [#allocation4], 896  }
  0x35   :  { %2940 = vsyncadd [#allocation4], 4294966400 }
  0x36   :  { %2941 = dma.done.wait [#allocation7], 33280  }
  0x37   :  { %2942 = vsyncadd [#allocation7], 4294934016  ;;  %v2461_v0 = vld [vmem:[#allocation6 + $0x4] ss:$16 sps:$4 sm:$0xff]   ;;  %v2465_v2 = vld [vmem:[#allocation6] ss:$16 sps:$4 sm:$0xff]  }
  0x38   :  { %v2463_v1 = vld [vmem:[#allocation6 + $0x204] ss:$16 sps:$4 sm:$0xff]   ;;  %1284 = vmatprep.subr.bf16.mxu1 %v2461_v0  ;;  %v2466_v3 = vld [vmem:[#allocation6 + $0x200] ss:$16 sps:$4 sm:$0xff]   ;;  %vm1280_vm0 = vcmask 130048   ;;  %s2953_s20 = smov [#allocation9]  }
  0x39   :  { %1325 = vmatprep.subr.bf16.mxu0 %v2463_v1  ;;  %v2467_v4 = vld [vmem:[#allocation6 + $0x24] ss:$16 sps:$4 sm:$0xff]   ;;  %1285 = vmatpush1.bf16.msra.mxu1 %v2465_v2  ;;  %v2471_v6 = vld [vmem:[#allocation6 + $0x20] ss:$16 sps:$4 sm:$0xff]   ;;  %s2148_s21 = sshll.u32 %s2953_s20, 4  ;;  %vm2140_vm7 = vcmask 57344   ;;  %s2149_s21 = int_to_ptr.vmem [resolvable:$true] %s2148_s21 }
  0x3a   :  { %1326 = vmatpush1.bf16.msra.mxu0 %v2466_v3  ;;  %v2469_v5 = vld [vmem:[#allocation6 + $0x224] ss:$16 sps:$4 sm:$0xff]   ;;  %1286 = vmatprep.subr.bf16.mxu1 %v2467_v4  ;;  %v2472_v7 = vld [vmem:[#allocation6 + $0x220] ss:$16 sps:$4 sm:$0xff]   ;;  %v68_v4 = vld [vmem:[#allocation3] sm:$0xff]  ;;  %s2917_s22 = scalar_lea.vmem %s2149_s21, 16  ;;  %p2922_p11 = scmp.lt.s32.totalorder %s2149_s21, %s2149_s21 }
  0x3b   :  { %1327 = vmatprep.subr.bf16.mxu0 %v2469_v5  ;;  %v2473_v8 = vld [vmem:[#allocation6 + $0x44] ss:$16 sps:$4 sm:$0xff]   ;;  %v2477_v10 = vld [vmem:[#allocation6 + $0x40] ss:$16 sps:$4 sm:$0xff]   ;;  %p2918_p10 = scmp.ne.s32.totalorder %s2149_s21, %s2917_s22  ;;  %s2921_s23 = scalar_lea.vmem %s2149_s21, 32 }
  0x3c   :  { %v2475_v9 = vld [vmem:[#allocation6 + $0x244] ss:$16 sps:$4 sm:$0xff]   ;;  %v2478_v11 = vld [vmem:[#allocation6 + $0x240] ss:$16 sps:$4 sm:$0xff]   ;;  %p2923_p12 = scmp.lt.s32.totalorder %s2921_s23, %s2917_s22 }
  0x3d   :  { %1287 = vmatpush1.bf16.msra.mxu1 %v2471_v6  ;;  %v2479_v12 = vld [vmem:[#allocation6 + $0x64] ss:$16 sps:$4 sm:$0xff]   ;;  %v2483_v14 = vld [vmem:[#allocation6 + $0x60] ss:$16 sps:$4 sm:$0xff]   ;;  %v70_v6 = vld [vmem:[#allocation3 + $0x10] sm:$0xff] }
  0x3e   :  { %1328 = vmatpush1.bf16.msra.mxu0 %v2472_v7  ;;  %1288 = vmatprep.subr.bf16.mxu1 %v2473_v8  ;;  %v2481_v13 = vld [vmem:[#allocation6 + $0x264] ss:$16 sps:$4 sm:$0xff]   ;;  %v2484_v15 = vld [vmem:[#allocation6 + $0x260] ss:$16 sps:$4 sm:$0xff]   ;;  %v2562_v7 = vld [vmem:[#allocation6 + $0xc] ss:$16 sps:$4 sm:$0xff]   ;;  %v3036_v8 = vpack.c.bf16 %v68_v4, %v68_v4  ;;  %p2924_p13 = por %p2923_p12, %p2922_p11 }
  0x3f   :  { %1329 = vmatprep.subr.bf16.mxu0 %v2475_v9  ;;  %v2485_v16 = vld [vmem:[#allocation6 + $0x84] ss:$16 sps:$4 sm:$0xff]   ;;  %v2489_v18 = vld [vmem:[#allocation6 + $0x80] ss:$16 sps:$4 sm:$0xff]   ;;  %v2646_v4 = vld [vmem:[#allocation6 + $0x1cc] ss:$16 sps:$4 sm:$0xff]  }
  0x40   :  { %v2487_v17 = vld [vmem:[#allocation6 + $0x284] ss:$16 sps:$4 sm:$0xff]   ;;  %v2490_v19 = vld [vmem:[#allocation6 + $0x280] ss:$16 sps:$4 sm:$0xff]   ;;  %p2925_p0 = pnand %p2924_p13, %p2918_p10 }
  0x41   :  { %1289 = vmatpush1.bf16.msra.mxu1 %v2477_v10  ;;  %v2491_v20 = vld [vmem:[#allocation6 + $0xa4] ss:$16 sps:$4 sm:$0xff]   ;;  %v2495_v22 = vld [vmem:[#allocation6 + $0xa0] ss:$16 sps:$4 sm:$0xff]   ;;  %v2560_v10 = vld [vmem:[#allocation6 + $0x8] ss:$16 sps:$4 sm:$0xff]  }
  0x42   :  { %1330 = vmatpush1.bf16.msra.mxu0 %v2478_v11  ;;  %1290 = vmatprep.subr.bf16.mxu1 %v2479_v12  ;;  %v2493_v21 = vld [vmem:[#allocation6 + $0x2a4] ss:$16 sps:$4 sm:$0xff]   ;;  %v2496_v23 = vld [vmem:[#allocation6 + $0x2a0] ss:$16 sps:$4 sm:$0xff]   ;;  %v3038_v11 = vpack.c.bf16 %v70_v6, %v70_v6  ;;  %v2644_v6 = vld [vmem:[#allocation6 + $0x1c8] ss:$16 sps:$4 sm:$0xff]  }
  0x43   :  { %1331 = vmatprep.subr.bf16.mxu0 %v2481_v13  ;;  %v2497_v24 = vld [vmem:[#allocation6 + $0xc4] ss:$16 sps:$4 sm:$0xff]   ;;  %v2501_v26 = vld [vmem:[#allocation6 + $0xc0] ss:$16 sps:$4 sm:$0xff]   ;;  %v2568_v13 = vld [vmem:[#allocation6 + $0x2c] ss:$16 sps:$4 sm:$0xff]  }
  0x44   :  { %v2499_v25 = vld [vmem:[#allocation6 + $0x2c4] ss:$16 sps:$4 sm:$0xff]   ;;  %v2502_v27 = vld [vmem:[#allocation6 + $0x2c0] ss:$16 sps:$4 sm:$0xff]  }
  0x45   :  { %1291 = vmatpush1.bf16.msra.mxu1 %v2483_v14  ;;  %v2503_v28 = vld [vmem:[#allocation6 + $0xe4] ss:$16 sps:$4 sm:$0xff]   ;;  %v2507_v30 = vld [vmem:[#allocation6 + $0xe0] ss:$16 sps:$4 sm:$0xff]  }
  0x46   :  { %1332 = vmatpush1.bf16.msra.mxu0 %v2484_v15  ;;  %1292 = vmatprep.subr.bf16.mxu1 %v2485_v16  ;;  %v2505_v29 = vld [vmem:[#allocation6 + $0x2e4] ss:$16 sps:$4 sm:$0xff]   ;;  %v2508_v31 = vld [vmem:[#allocation6 + $0x2e0] ss:$16 sps:$4 sm:$0xff]   ;;  %v2566_v15 = vld [vmem:[#allocation6 + $0x28] ss:$16 sps:$4 sm:$0xff]  }
  0x47   :  { %1333 = vmatprep.subr.bf16.mxu0 %v2487_v17  ;;  %v2509_v32 = vld [vmem:[#allocation6 + $0x104] ss:$16 sps:$4 sm:$0xff]   ;;  %v2513_v34 = vld [vmem:[#allocation6 + $0x100] ss:$16 sps:$4 sm:$0xff]   ;;  %v2574_v17 = vld [vmem:[#allocation6 + $0x4c] ss:$16 sps:$4 sm:$0xff]  }
  0x48   :  { %v2511_v33 = vld [vmem:[#allocation6 + $0x304] ss:$16 sps:$4 sm:$0xff]   ;;  %v2514_v35 = vld [vmem:[#allocation6 + $0x300] ss:$16 sps:$4 sm:$0xff]  }
  0x49   :  { %1293 = vmatpush1.bf16.msra.mxu1 %v2489_v18  ;;  %v2515_v36 = vld [vmem:[#allocation6 + $0x124] ss:$16 sps:$4 sm:$0xff]   ;;  %v2519_v38 = vld [vmem:[#allocation6 + $0x120] ss:$16 sps:$4 sm:$0xff]  }
  0x4a   :  { %1334 = vmatpush1.bf16.msra.mxu0 %v2490_v19  ;;  %1294 = vmatprep.subr.bf16.mxu1 %v2491_v20  ;;  %v2517_v37 = vld [vmem:[#allocation6 + $0x324] ss:$16 sps:$4 sm:$0xff]   ;;  %v2520_v39 = vld [vmem:[#allocation6 + $0x320] ss:$16 sps:$4 sm:$0xff]   ;;  %v2572_v19 = vld [vmem:[#allocation6 + $0x48] ss:$16 sps:$4 sm:$0xff]  }
  0x4b   :  { %1335 = vmatprep.subr.bf16.mxu0 %v2493_v21  ;;  %v2521_v40 = vld [vmem:[#allocation6 + $0x144] ss:$16 sps:$4 sm:$0xff]   ;;  %v2525_v42 = vld [vmem:[#allocation6 + $0x140] ss:$16 sps:$4 sm:$0xff]   ;;  %v2580_v21 = vld [vmem:[#allocation6 + $0x6c] ss:$16 sps:$4 sm:$0xff]  }
  0x4c   :  { %v2523_v41 = vld [vmem:[#allocation6 + $0x344] ss:$16 sps:$4 sm:$0xff]   ;;  %v2526_v43 = vld [vmem:[#allocation6 + $0x340] ss:$16 sps:$4 sm:$0xff]  }
  0x4d   :  { %1295 = vmatpush1.bf16.msra.mxu1 %v2495_v22  ;;  %v2527_v44 = vld [vmem:[#allocation6 + $0x164] ss:$16 sps:$4 sm:$0xff]   ;;  %v2531_v47 = vld [vmem:[#allocation6 + $0x160] ss:$16 sps:$4 sm:$0xff]  }
  0x4e   :  { %1336 = vmatpush1.bf16.msra.mxu0 %v2496_v23  ;;  %1296 = vmatprep.subr.bf16.mxu1 %v2497_v24  ;;  %v2529_v45 = vld [vmem:[#allocation6 + $0x364] ss:$16 sps:$4 sm:$0xff]   ;;  %v2532_v50 = vld [vmem:[#allocation6 + $0x360] ss:$16 sps:$4 sm:$0xff]   ;;  %v2578_v23 = vld [vmem:[#allocation6 + $0x68] ss:$16 sps:$4 sm:$0xff]  }
  0x4f   :  { %1337 = vmatprep.subr.bf16.mxu0 %v2499_v25  ;;  %v69_v46 = vld [vmem:[#allocation3 + $0x8] sm:$0xff]  ;;  %v71_v49 = vld [vmem:[#allocation3 + $0x18] sm:$0xff]  ;;  %v2586_v25 = vld [vmem:[#allocation6 + $0x8c] ss:$16 sps:$4 sm:$0xff]  }
  0x50   :  { %v3030_v48 = vpack.c.bf16 %v69_v46, %v69_v46  ;;  %v2533_v51 = vld [vmem:[#allocation6 + $0x184] ss:$16 sps:$4 sm:$0xff]   ;;  %v3032_v52 = vpack.c.bf16 %v71_v49, %v71_v49  ;;  %v2537_v54 = vld [vmem:[#allocation6 + $0x180] ss:$16 sps:$4 sm:$0xff]   ;;  %v2614_v49 = vld [vmem:[#allocation6 + $0x128] ss:$16 sps:$4 sm:$0xff]  }
  0x51   :  { %1297 = vmatpush1.bf16.msra.mxu1 %v2501_v26  ;;  %v2535_v53 = vld [vmem:[#allocation6 + $0x384] ss:$16 sps:$4 sm:$0xff]   ;;  %v2538_v55 = vld [vmem:[#allocation6 + $0x380] ss:$16 sps:$4 sm:$0xff]  }
  0x52   :  { %1338 = vmatpush1.bf16.msra.mxu0 %v2502_v27  ;;  %1298 = vmatprep.subr.bf16.mxu1 %v2503_v28  ;;  %v2539_v56 = vld [vmem:[#allocation6 + $0x1a4] ss:$16 sps:$4 sm:$0xff]   ;;  %v2543_v58 = vld [vmem:[#allocation6 + $0x1a0] ss:$16 sps:$4 sm:$0xff]   ;;  %v2584_v27 = vld [vmem:[#allocation6 + $0x88] ss:$16 sps:$4 sm:$0xff]  }
  0x53   :  { %1339 = vmatprep.subr.bf16.mxu0 %v2505_v29  ;;  %1316 = vmatprep.mubr.bf16.mxu1 %v3030_v48  ;;  %v2541_v57 = vld [vmem:[#allocation6 + $0x3a4] ss:$16 sps:$4 sm:$0xff]   ;;  %v2544_v59 = vld [vmem:[#allocation6 + $0x3a0] ss:$16 sps:$4 sm:$0xff]   ;;  %v2592_v29 = vld [vmem:[#allocation6 + $0xac] ss:$16 sps:$4 sm:$0xff]  }
  0x54   :  { %1357 = vmatprep.mubr.bf16.mxu0 %v3032_v52  ;;  %v2545_v60 = vld [vmem:[#allocation6 + $0x1c4] ss:$16 sps:$4 sm:$0xff]   ;;  %v2549_v62 = vld [vmem:[#allocation6 + $0x1c0] ss:$16 sps:$4 sm:$0xff]  }
  0x55   :  { %1299 = vmatpush1.bf16.msra.mxu1 %v2507_v30  ;;  %v2547_v61 = vld [vmem:[#allocation6 + $0x3c4] ss:$16 sps:$4 sm:$0xff]   ;;  %v2550_v63 = vld [vmem:[#allocation6 + $0x3c0] ss:$16 sps:$4 sm:$0xff]  }
  0x56   :  { %1340 = vmatpush1.bf16.msra.mxu0 %v2508_v31  ;;  %1300 = vmatprep.subr.bf16.mxu1 %v2509_v32  ;;  %v2551_v0 = vld [vmem:[#allocation6 + $0x1e4] ss:$16 sps:$4 sm:$0xff]   ;;  %v2555_v2 = vld [vmem:[#allocation6 + $0x1e0] ss:$16 sps:$4 sm:$0xff]   ;;  %v2590_v31 = vld [vmem:[#allocation6 + $0xa8] ss:$16 sps:$4 sm:$0xff]  }
  0x57   :  { %1341 = vmatprep.subr.bf16.mxu0 %v2511_v33  ;;  %v2553_v1 = vld [vmem:[#allocation6 + $0x3e4] ss:$16 sps:$4 sm:$0xff]   ;;  %v2556_v3 = vld [vmem:[#allocation6 + $0x3e0] ss:$16 sps:$4 sm:$0xff]   ;;  %v2598_v33 = vld [vmem:[#allocation6 + $0xcc] ss:$16 sps:$4 sm:$0xff]  }
  0x58   :  { %v2559_v5 = vld [vmem:[#allocation6 + $0x404] ss:$16 sps:$4 sm:$0xff]   ;;  %v2557_v9 = vld [vmem:[#allocation6 + $0x400] ss:$16 sps:$4 sm:$0xff]  }
  0x59   :  { %1301 = vmatpush1.bf16.msra.mxu1 %v2513_v34  ;;  %v2565_v12 = vld [vmem:[#allocation6 + $0x424] ss:$16 sps:$4 sm:$0xff]   ;;  %v2563_v14 = vld [vmem:[#allocation6 + $0x420] ss:$16 sps:$4 sm:$0xff]  }
  0x5a   :  { %1342 = vmatpush1.bf16.msra.mxu0 %v2514_v35  ;;  %1302 = vmatprep.subr.bf16.mxu1 %v2515_v36  ;;  %v2571_v16 = vld [vmem:[#allocation6 + $0x444] ss:$16 sps:$4 sm:$0xff]   ;;  %v2569_v18 = vld [vmem:[#allocation6 + $0x440] ss:$16 sps:$4 sm:$0xff]  }
  0x5b   :  { %1343 = vmatprep.subr.bf16.mxu0 %v2517_v37  ;;  %v2577_v20 = vld [vmem:[#allocation6 + $0x464] ss:$16 sps:$4 sm:$0xff]   ;;  %v2575_v22 = vld [vmem:[#allocation6 + $0x460] ss:$16 sps:$4 sm:$0xff]   ;;  %v2596_v37 = vld [vmem:[#allocation6 + $0xc8] ss:$16 sps:$4 sm:$0xff]  }
  0x5c   :  { %v2583_v24 = vld [vmem:[#allocation6 + $0x484] ss:$16 sps:$4 sm:$0xff]   ;;  %v2581_v26 = vld [vmem:[#allocation6 + $0x480] ss:$16 sps:$4 sm:$0xff]  }
  0x5d   :  { %1303 = vmatpush1.bf16.msra.mxu1 %v2519_v38  ;;  %v2589_v28 = vld [vmem:[#allocation6 + $0x4a4] ss:$16 sps:$4 sm:$0xff]   ;;  %v2587_v30 = vld [vmem:[#allocation6 + $0x4a0] ss:$16 sps:$4 sm:$0xff]  }
  0x5e   :  { %1344 = vmatpush1.bf16.msra.mxu0 %v2520_v39  ;;  %1304 = vmatprep.subr.bf16.mxu1 %v2521_v40  ;;  %v2595_v32 = vld [vmem:[#allocation6 + $0x4c4] ss:$16 sps:$4 sm:$0xff]   ;;  %v2593_v36 = vld [vmem:[#allocation6 + $0x4c0] ss:$16 sps:$4 sm:$0xff]   ;;  %v2604_v39 = vld [vmem:[#allocation6 + $0xec] ss:$16 sps:$4 sm:$0xff]  }
  0x5f   :  { %1345 = vmatprep.subr.bf16.mxu0 %v2523_v41  ;;  %v73_v34 = vld [vmem:[#allocation3 + $0x28] sm:$0xff]  ;;  %v2602_v41 = vld [vmem:[#allocation6 + $0xe8] ss:$16 sps:$4 sm:$0xff]  }
  0x60   :  { %v3043_v35 = vpack.c.bf16 %v73_v34, %v73_v34  ;;  %v2601_v38 = vld [vmem:[#allocation6 + $0x4e4] ss:$16 sps:$4 sm:$0xff]   ;;  %v2599_v40 = vld [vmem:[#allocation6 + $0x4e0] ss:$16 sps:$4 sm:$0xff]  }
  0x61   :  { %1305 = vmatpush1.bf16.msra.mxu1 %v2525_v42  ;;  %v2607_v42 = vld [vmem:[#allocation6 + $0x504] ss:$16 sps:$4 sm:$0xff]  }
  0x62   :  { %1346 = vmatpush1.bf16.msra.mxu0 %v2526_v43  ;;  %1306 = vmatprep.subr.bf16.mxu1 %v2527_v44  ;;  %v2610_v43 = vld [vmem:[#allocation6 + $0x10c] ss:$16 sps:$4 sm:$0xff]   ;;  %v2605_v44 = vld [vmem:[#allocation6 + $0x500] ss:$16 sps:$4 sm:$0xff]   ;;  %v2613_v46 = vld [vmem:[#allocation6 + $0x524] ss:$16 sps:$4 sm:$0xff]  }
  0x63   :  { %1347 = vmatprep.subr.bf16.mxu0 %v2529_v45  ;;  %v2608_v45 = vld [vmem:[#allocation6 + $0x108] ss:$16 sps:$4 sm:$0xff]   ;;  %v2757_v34 = vld [vmem:[#allocation8 + $0x4] ss:$8 sps:$4 sm:$0xff]  }
  0x65   :  { %1307 = vmatpush1.bf16.msra.mxu1 %v2531_v47  ;;  %v2616_v47 = vld [vmem:[#allocation6 + $0x12c] ss:$16 sps:$4 sm:$0xff]  }
  0x66   :  { %1348 = vmatpush1.bf16.msra.mxu0 %v2532_v50  ;;  %1308 = vmatprep.subr.bf16.mxu1 %v2533_v51  ;;  %v2619_v50 = vld [vmem:[#allocation6 + $0x544] ss:$16 sps:$4 sm:$0xff]   ;;  %v2622_v51 = vld [vmem:[#allocation6 + $0x14c] ss:$16 sps:$4 sm:$0xff]  }
  0x67   :  { %1349 = vmatprep.subr.bf16.mxu0 %v2535_v53  ;;  %v2617_v53 = vld [vmem:[#allocation6 + $0x540] ss:$16 sps:$4 sm:$0xff]  }
  0x69   :  { %1309 = vmatpush1.bf16.msra.mxu1 %v2537_v54  ;;  %v2620_v54 = vld [vmem:[#allocation6 + $0x148] ss:$16 sps:$4 sm:$0xff]  }
  0x6a   :  { %1350 = vmatpush1.bf16.msra.mxu0 %v2538_v55  ;;  %1310 = vmatprep.subr.bf16.mxu1 %v2539_v56  ;;  %v2625_v55 = vld [vmem:[#allocation6 + $0x564] ss:$16 sps:$4 sm:$0xff]   ;;  %v2628_v56 = vld [vmem:[#allocation6 + $0x16c] ss:$16 sps:$4 sm:$0xff]  }
  0x6b   :  { %1351 = vmatprep.subr.bf16.mxu0 %v2541_v57  ;;  %v2623_v57 = vld [vmem:[#allocation6 + $0x560] ss:$16 sps:$4 sm:$0xff]  }
  0x6d   :  { %1311 = vmatpush1.bf16.msra.mxu1 %v2543_v58  ;;  %v2626_v58 = vld [vmem:[#allocation6 + $0x168] ss:$16 sps:$4 sm:$0xff]  }
  0x6e   :  { %1352 = vmatpush1.bf16.msra.mxu0 %v2544_v59  ;;  %1312 = vmatprep.subr.bf16.mxu1 %v2545_v60  ;;  %v2631_v59 = vld [vmem:[#allocation6 + $0x584] ss:$16 sps:$4 sm:$0xff]   ;;  %v2634_v60 = vld [vmem:[#allocation6 + $0x18c] ss:$16 sps:$4 sm:$0xff]  }
  0x6f   :  { %1353 = vmatprep.subr.bf16.mxu0 %v2547_v61  ;;  %v2629_v61 = vld [vmem:[#allocation6 + $0x580] ss:$16 sps:$4 sm:$0xff]  }
  0x71   :  { %1313 = vmatpush1.bf16.msra.mxu1 %v2549_v62  ;;  %v2632_v62 = vld [vmem:[#allocation6 + $0x188] ss:$16 sps:$4 sm:$0xff]  }
  0x72   :  { %1354 = vmatpush1.bf16.msra.mxu0 %v2550_v63  ;;  %1314 = vmatprep.subr.bf16.mxu1 %v2551_v0  ;;  %v2637_v63 = vld [vmem:[#allocation6 + $0x5a4] ss:$16 sps:$4 sm:$0xff]   ;;  %v2640_v0 = vld [vmem:[#allocation6 + $0x1ac] ss:$16 sps:$4 sm:$0xff]  }
  0x73   :  { %1355 = vmatprep.subr.bf16.mxu0 %v2553_v1  ;;  %v2635_v1 = vld [vmem:[#allocation6 + $0x5a0] ss:$16 sps:$4 sm:$0xff]  }
  0x75   :  { %1315 = vmatpush1.bf16.msra.mxu1 %v2555_v2  ;;  %v2638_v2 = vld [vmem:[#allocation6 + $0x1a8] ss:$16 sps:$4 sm:$0xff]  }
  0x76   :  { %1356 = vmatpush1.bf16.msra.mxu0 %v2556_v3  ;;  %1448 = vmatprep.subr.bf16.mxu1 %v2562_v7  ;;  %v2643_v3 = vld [vmem:[#allocation6 + $0x5c4] ss:$16 sps:$4 sm:$0xff]  }
  0x77   :  { %1366 = vmatprep.subr.bf16.mxu0 %v2559_v5  ;;  %v2641_v5 = vld [vmem:[#allocation6 + $0x5c0] ss:$16 sps:$4 sm:$0xff]   ;;  %v2649_v7 = vld [vmem:[#allocation6 + $0x5e4] ss:$16 sps:$4 sm:$0xff]  }
  0x78   :  { %1317 = vmatmul.mubr.bf16.vlgmr.msra.gmra.mrb[0].mxu1 %v3036_v8 }
  0x79   :  { %1358 = vmatmul.mubr.bf16.vlgmr.msra.gmra.mrb[0].mxu0 %v3038_v11  ;;  %1449 = vmatpush1.bf16.msra.mxu1 %v2560_v10  ;;  %v2647_v10 = vld [vmem:[#allocation6 + $0x5e0] ss:$16 sps:$4 sm:$0xff]  }
  0x7a   :  { %1367 = vmatpush1.bf16.msra.mxu0 %v2557_v9  ;;  %1450 = vmatprep.subr.bf16.mxu1 %v2568_v13  ;;  %v2652_v9 = vld [vmem:[#allocation6 + $0x1ec] ss:$16 sps:$4 sm:$0xff]  }
  0x7b   :  { %1368 = vmatprep.subr.bf16.mxu0 %v2565_v12  ;;  %1480 = vmatprep.mubr.bf16.mxu1 %v3030_v48  ;;  %v2611_v48 = vld [vmem:[#allocation6 + $0x520] ss:$16 sps:$4 sm:$0xff]   ;;  %v2650_v12 = vld [vmem:[#allocation6 + $0x1e8] ss:$16 sps:$4 sm:$0xff]  }
  0x7c   :  { %1398 = vmatprep.mubr.bf16.mxu0 %v3043_v35  ;;  %v72_v13 = vld [vmem:[#allocation3 + $0x20] sm:$0xff] }
  0x7d   :  { %1451 = vmatpush1.bf16.msra.mxu1 %v2566_v15  ;;  %v2661_v15 = vld [vmem:[#allocation6 + $0x604] ss:$16 sps:$4 sm:$0xff]  }
  0x7e   :  { %1369 = vmatpush1.bf16.msra.mxu0 %v2563_v14  ;;  %1452 = vmatprep.subr.bf16.mxu1 %v2574_v17  ;;  %v2655_v14 = vld [vmem:[#allocation6 + $0x20c] ss:$16 sps:$4 sm:$0xff]   ;;  %v2653_v17 = vld [vmem:[#allocation6 + $0x208] ss:$16 sps:$4 sm:$0xff]  }
  0x7f   :  { %1370 = vmatprep.subr.bf16.mxu0 %v2571_v16  ;;  %v3046_v16 = vpack.c.bf16 %v72_v13, %v72_v13  ;;  %v2709_v13 = vld [vmem:[#allocation6 + $0x42c] ss:$16 sps:$4 sm:$0xff]  }
  0x81   :  { %1453 = vmatpush1.bf16.msra.mxu1 %v2572_v19  ;;  %v2658_v19 = vld [vmem:[#allocation6 + $0x22c] ss:$16 sps:$4 sm:$0xff]  }
  0x82   :  { %1371 = vmatpush1.bf16.msra.mxu0 %v2569_v18  ;;  %1454 = vmatprep.subr.bf16.mxu1 %v2580_v21  ;;  %v2659_v18 = vld [vmem:[#allocation6 + $0x600] ss:$16 sps:$4 sm:$0xff]   ;;  %v2664_v21 = vld [vmem:[#allocation6 + $0x24c] ss:$16 sps:$4 sm:$0xff]  }
  0x83   :  { %1372 = vmatprep.subr.bf16.mxu0 %v2577_v20  ;;  %v2656_v20 = vld [vmem:[#allocation6 + $0x228] ss:$16 sps:$4 sm:$0xff]  }
  0x85   :  { %1455 = vmatpush1.bf16.msra.mxu1 %v2578_v23  ;;  %v2662_v23 = vld [vmem:[#allocation6 + $0x248] ss:$16 sps:$4 sm:$0xff]  }
  0x86   :  { %1373 = vmatpush1.bf16.msra.mxu0 %v2575_v22  ;;  %1456 = vmatprep.subr.bf16.mxu1 %v2586_v25  ;;  %v2952_v22 = vmov 0   ;;  %v2667_v25 = vld [vmem:[#allocation6 + $0x26c] ss:$16 sps:$4 sm:$0xff]  }
  0x87   :  { %1374 = vmatprep.subr.bf16.mxu0 %v2583_v24  ;;  %v74_v24 = vld [vmem:[#allocation3 + $0x30] sm:$0xff] }
  0x89   :  { %1457 = vmatpush1.bf16.msra.mxu1 %v2584_v27  ;;  %v3052_v27 = vpack.c.bf16 %v74_v24, %v74_v24  ;;  %v2791_v24 = vld [vmem:[#allocation8 + $0xc0] ss:$8 sps:$4 sm:$0xff]  }
  0x8a   :  { %1375 = vmatpush1.bf16.msra.mxu0 %v2581_v26  ;;  %1458 = vmatprep.subr.bf16.mxu1 %v2592_v29  ;;  %v2665_v26 = vld [vmem:[#allocation6 + $0x268] ss:$16 sps:$4 sm:$0xff]   ;;  %v2673_v29 = vld [vmem:[#allocation6 + $0x2ac] ss:$16 sps:$4 sm:$0xff]  }
  0x8b   :  { %1376 = vmatprep.subr.bf16.mxu0 %v2589_v28  ;;  %v2670_v28 = vld [vmem:[#allocation6 + $0x28c] ss:$16 sps:$4 sm:$0xff]  }
  0x8d   :  { %1459 = vmatpush1.bf16.msra.mxu1 %v2590_v31  ;;  %v2676_v31 = vld [vmem:[#allocation6 + $0x2cc] ss:$16 sps:$4 sm:$0xff]  }
  0x8e   :  { %1377 = vmatpush1.bf16.msra.mxu0 %v2587_v30  ;;  %1460 = vmatprep.subr.bf16.mxu1 %v2598_v33  ;;  %v2671_v30 = vld [vmem:[#allocation6 + $0x2a8] ss:$16 sps:$4 sm:$0xff]  }
  0x8f   :  { %1378 = vmatprep.subr.bf16.mxu0 %v2595_v32  ;;  %v2679_v32 = vld [vmem:[#allocation6 + $0x2ec] ss:$16 sps:$4 sm:$0xff]   ;;  %v2755_v33 = vld [vmem:[#allocation8] ss:$8 sps:$4 sm:$0xff]  }
  0x91   :  { %1461 = vmatpush1.bf16.msra.mxu1 %v2596_v37  ;;  %v2677_v37 = vld [vmem:[#allocation6 + $0x2e8] ss:$16 sps:$4 sm:$0xff]  }
  0x92   :  { %1379 = vmatpush1.bf16.msra.mxu0 %v2593_v36  ;;  %1462 = vmatprep.subr.bf16.mxu1 %v2604_v39  ;;  %v2760_v36 = vld [vmem:[#allocation8 + $0x14] ss:$8 sps:$4 sm:$0xff]  }
  0x93   :  { %1380 = vmatprep.subr.bf16.mxu0 %v2601_v38  ;;  %v2758_v38 = vld [vmem:[#allocation8 + $0x10] ss:$8 sps:$4 sm:$0xff]   ;;  %v2682_v39 = vld [vmem:[#allocation6 + $0x30c] ss:$16 sps:$4 sm:$0xff]  }
  0x95   :  { %1463 = vmatpush1.bf16.msra.mxu1 %v2602_v41  ;;  %v2680_v41 = vld [vmem:[#allocation6 + $0x308] ss:$16 sps:$4 sm:$0xff]  }
  0x96   :  { %1381 = vmatpush1.bf16.msra.mxu0 %v2599_v40  ;;  %1464 = vmatprep.subr.bf16.mxu1 %v2610_v43  ;;  %v2763_v40 = vld [vmem:[#allocation8 + $0x24] ss:$8 sps:$4 sm:$0xff]  }
  0x97   :  { %1382 = vmatprep.subr.bf16.mxu0 %v2607_v42  ;;  %v2761_v42 = vld [vmem:[#allocation8 + $0x20] ss:$8 sps:$4 sm:$0xff]   ;;  %v2685_v43 = vld [vmem:[#allocation6 + $0x32c] ss:$16 sps:$4 sm:$0xff]  }
  0x99   :  { %1465 = vmatpush1.bf16.msra.mxu1 %v2608_v45  ;;  %v2683_v45 = vld [vmem:[#allocation6 + $0x328] ss:$16 sps:$4 sm:$0xff]  }
  0x9a   :  { %1383 = vmatpush1.bf16.msra.mxu0 %v2605_v44  ;;  %1466 = vmatprep.subr.bf16.mxu1 %v2616_v47  ;;  %v2766_v44 = vld [vmem:[#allocation8 + $0x34] ss:$8 sps:$4 sm:$0xff]  }
  0x9b   :  { %1384 = vmatprep.subr.bf16.mxu0 %v2613_v46  ;;  %v2764_v46 = vld [vmem:[#allocation8 + $0x30] ss:$8 sps:$4 sm:$0xff]   ;;  %v2688_v47 = vld [vmem:[#allocation6 + $0x34c] ss:$16 sps:$4 sm:$0xff]  }
  0x9d   :  { %1467 = vmatpush1.bf16.msra.mxu1 %v2614_v49  ;;  %v2686_v49 = vld [vmem:[#allocation6 + $0x348] ss:$16 sps:$4 sm:$0xff]  }
  0x9e   :  { %1385 = vmatpush1.bf16.msra.mxu0 %v2611_v48  ;;  %1468 = vmatprep.subr.bf16.mxu1 %v2622_v51  ;;  %v2769_v48 = vld [vmem:[#allocation8 + $0x44] ss:$8 sps:$4 sm:$0xff]  }
  0x9f   :  { %1386 = vmatprep.subr.bf16.mxu0 %v2619_v50  ;;  %v2767_v50 = vld [vmem:[#allocation8 + $0x40] ss:$8 sps:$4 sm:$0xff]   ;;  %v2691_v51 = vld [vmem:[#allocation6 + $0x36c] ss:$16 sps:$4 sm:$0xff]  }
  0xa1   :  { %1469 = vmatpush1.bf16.msra.mxu1 %v2620_v54  ;;  %v2689_v54 = vld [vmem:[#allocation6 + $0x368] ss:$16 sps:$4 sm:$0xff]  }
  0xa2   :  { %1387 = vmatpush1.bf16.msra.mxu0 %v2617_v53  ;;  %1470 = vmatprep.subr.bf16.mxu1 %v2628_v56  ;;  %v2772_v53 = vld [vmem:[#allocation8 + $0x54] ss:$8 sps:$4 sm:$0xff]  }
  0xa3   :  { %1388 = vmatprep.subr.bf16.mxu0 %v2625_v55  ;;  %v2770_v55 = vld [vmem:[#allocation8 + $0x50] ss:$8 sps:$4 sm:$0xff]   ;;  %v2694_v56 = vld [vmem:[#allocation6 + $0x38c] ss:$16 sps:$4 sm:$0xff]  }
  0xa5   :  { %1471 = vmatpush1.bf16.msra.mxu1 %v2626_v58  ;;  %v2692_v58 = vld [vmem:[#allocation6 + $0x388] ss:$16 sps:$4 sm:$0xff]  }
  0xa6   :  { %1389 = vmatpush1.bf16.msra.mxu0 %v2623_v57  ;;  %1472 = vmatprep.subr.bf16.mxu1 %v2634_v60  ;;  %v2775_v57 = vld [vmem:[#allocation8 + $0x64] ss:$8 sps:$4 sm:$0xff]  }
  0xa7   :  { %1390 = vmatprep.subr.bf16.mxu0 %v2631_v59  ;;  %v2773_v59 = vld [vmem:[#allocation8 + $0x60] ss:$8 sps:$4 sm:$0xff]   ;;  %v2697_v60 = vld [vmem:[#allocation6 + $0x3ac] ss:$16 sps:$4 sm:$0xff]  }
  0xa9   :  { %1473 = vmatpush1.bf16.msra.mxu1 %v2632_v62  ;;  %v2695_v62 = vld [vmem:[#allocation6 + $0x3a8] ss:$16 sps:$4 sm:$0xff]  }
  0xaa   :  { %1391 = vmatpush1.bf16.msra.mxu0 %v2629_v61  ;;  %1474 = vmatprep.subr.bf16.mxu1 %v2640_v0  ;;  %v2778_v61 = vld [vmem:[#allocation8 + $0x74] ss:$8 sps:$4 sm:$0xff]  }
  0xab   :  { %1392 = vmatprep.subr.bf16.mxu0 %v2637_v63  ;;  %v2776_v63 = vld [vmem:[#allocation8 + $0x70] ss:$8 sps:$4 sm:$0xff]   ;;  %v2700_v0 = vld [vmem:[#allocation6 + $0x3cc] ss:$16 sps:$4 sm:$0xff]  }
  0xad   :  { %1475 = vmatpush1.bf16.msra.mxu1 %v2638_v2  ;;  %v2698_v2 = vld [vmem:[#allocation6 + $0x3c8] ss:$16 sps:$4 sm:$0xff]  }
  0xae   :  { %1393 = vmatpush1.bf16.msra.mxu0 %v2635_v1  ;;  %1476 = vmatprep.subr.bf16.mxu1 %v2646_v4  ;;  %v2781_v1 = vld [vmem:[#allocation8 + $0x84] ss:$8 sps:$4 sm:$0xff]  }
  0xaf   :  { %1394 = vmatprep.subr.bf16.mxu0 %v2643_v3  ;;  %v2779_v3 = vld [vmem:[#allocation8 + $0x80] ss:$8 sps:$4 sm:$0xff]   ;;  %v2703_v4 = vld [vmem:[#allocation6 + $0x3ec] ss:$16 sps:$4 sm:$0xff]  }
  0xb1   :  { %1477 = vmatpush1.bf16.msra.mxu1 %v2644_v6  ;;  %v2701_v6 = vld [vmem:[#allocation6 + $0x3e8] ss:$16 sps:$4 sm:$0xff]  }
  0xb2   :  { %1395 = vmatpush1.bf16.msra.mxu0 %v2641_v5  ;;  %1478 = vmatprep.subr.bf16.mxu1 %v2652_v9  ;;  %v2784_v5 = vld [vmem:[#allocation8 + $0x94] ss:$8 sps:$4 sm:$0xff]  }
  0xb3   :  { %1396 = vmatprep.subr.bf16.mxu0 %v2649_v7  ;;  %v2782_v7 = vld [vmem:[#allocation8 + $0x90] ss:$8 sps:$4 sm:$0xff]   ;;  %v2706_v9 = vld [vmem:[#allocation6 + $0x40c] ss:$16 sps:$4 sm:$0xff]  }
  0xb5   :  { %1479 = vmatpush1.bf16.msra.mxu1 %v2650_v12  ;;  %v2704_v12 = vld [vmem:[#allocation6 + $0x408] ss:$16 sps:$4 sm:$0xff]  }
  0xb6   :  { %1397 = vmatpush1.bf16.msra.mxu0 %v2647_v10  ;;  %1489 = vmatprep.subr.bf16.mxu1 %v2655_v14  ;;  %v2787_v10 = vld [vmem:[#allocation8 + $0xa4] ss:$8 sps:$4 sm:$0xff]   ;;  %v2785_v14 = vld [vmem:[#allocation8 + $0xa0] ss:$8 sps:$4 sm:$0xff]  }
  0xb7   :  { %1407 = vmatprep.subr.bf16.mxu0 %v2661_v15  ;;  %v2790_v15 = vld [vmem:[#allocation8 + $0xb4] ss:$8 sps:$4 sm:$0xff]  }
  0xb8   :  { %1481 = vmatmul.mubr.bf16.vlgmr.msra.gmra.mrb[4].mxu1 %v3036_v8  ;;  %v2668_v8 = vld [vmem:[#allocation6 + $0x288] ss:$16 sps:$4 sm:$0xff]  }
  0xb9   :  { %1399 = vmatmul.mubr.bf16.vlgmr.msra.gmra.mrb[0].mxu0 %v3046_v16  ;;  %1490 = vmatpush1.bf16.msra.mxu1 %v2653_v17  ;;  %v2707_v17 = vld [vmem:[#allocation6 + $0x428] ss:$16 sps:$4 sm:$0xff]  }
  0xba   :  { %1408 = vmatpush1.bf16.msra.mxu0 %v2659_v18  ;;  %1491 = vmatprep.subr.bf16.mxu1 %v2658_v19  ;;  %v2712_v18 = vld [vmem:[#allocation6 + $0x44c] ss:$16 sps:$4 sm:$0xff]   ;;  %v2788_v19 = vld [vmem:[#allocation8 + $0xb0] ss:$8 sps:$4 sm:$0xff]  }
  0xbb   :  { %1439 = vmatprep.mubr.bf16.mxu0 %v2952_v22  ;;  %1521 = vmatprep.mubr.bf16.mxu1 %v3032_v52  ;;  %v2674_v52 = vld [vmem:[#allocation6 + $0x2c8] ss:$16 sps:$4 sm:$0xff]  }
  0xbc   :  { %2024 = vmatprep.subr.bf16.mxu0 %v2757_v34  ;;  %v2728_v34 = vld [vmem:[#allocation6 + $0x508] ss:$16 sps:$4 sm:$0xff]  }
  0xbd   :  { %1492 = vmatpush1.bf16.msra.mxu1 %v2656_v20  ;;  %v2793_v20 = vld [vmem:[#allocation8 + $0xc4] ss:$8 sps:$4 sm:$0xff]  }
  0xbe   :  { %1493 = vmatprep.subr.bf16.mxu1 %v2664_v21  ;;  %v2710_v21 = vld [vmem:[#allocation6 + $0x448] ss:$16 sps:$4 sm:$0xff]  }
  0xc1   :  { %1494 = vmatpush1.bf16.msra.mxu1 %v2662_v23  ;;  %v2715_v23 = vld [vmem:[#allocation6 + $0x46c] ss:$16 sps:$4 sm:$0xff]  }
  0xc2   :  { %1495 = vmatprep.subr.bf16.mxu1 %v2667_v25  ;;  %v2796_v25 = vld [vmem:[#allocation8 + $0xd4] ss:$8 sps:$4 sm:$0xff]  }
  0xc5   :  { %2354 = vmatmul.mubr.msk.bf16.vlgmr.msra.gmra.mrb[0].mxu0 %vm1280_vm0, %v3052_v27  ;;  %1496 = vmatpush1.bf16.msra.mxu1 %v2665_v26  ;;  %v2718_v26 = vld [vmem:[#allocation6 + $0x48c] ss:$16 sps:$4 sm:$0xff]  }
  0xc6   :  { %1497 = vmatprep.subr.bf16.mxu1 %v2670_v28  ;;  %2025 = vmatpush1.bf16.msra.mxu0 %v2755_v33  ;;  %v2716_v28 = vld [vmem:[#allocation6 + $0x488] ss:$16 sps:$4 sm:$0xff]   ;;  %v2730_v33 = vld [vmem:[#allocation6 + $0x50c] ss:$16 sps:$4 sm:$0xff]  }
  0xc7   :  { %2026 = vmatprep.subr.bf16.mxu0 %v2760_v36  ;;  %v2733_v36 = vld [vmem:[#allocation6 + $0x52c] ss:$16 sps:$4 sm:$0xff]  }
  0xc9   :  { %1498 = vmatpush1.bf16.msra.mxu1 %v2668_v8  ;;  %v2721_v8 = vld [vmem:[#allocation6 + $0x4ac] ss:$16 sps:$4 sm:$0xff]  }
  0xca   :  { %1499 = vmatprep.subr.bf16.mxu1 %v2673_v29  ;;  %2027 = vmatpush1.bf16.msra.mxu0 %v2758_v38  ;;  %v2719_v29 = vld [vmem:[#allocation6 + $0x4a8] ss:$16 sps:$4 sm:$0xff]  }
  0xcb   :  { %2028 = vmatprep.subr.bf16.mxu0 %v2763_v40  ;;  %v2797_v38 = vld [vmem:[#allocation8 + $0xe0] ss:$8 sps:$4 sm:$0xff]   ;;  %v2736_v40 = vld [vmem:[#allocation6 + $0x54c] ss:$16 sps:$4 sm:$0xff]  }
  0xcd   :  { %1500 = vmatpush1.bf16.msra.mxu1 %v2671_v30  ;;  %v2724_v30 = vld [vmem:[#allocation6 + $0x4cc] ss:$16 sps:$4 sm:$0xff]  }
  0xce   :  { %1501 = vmatprep.subr.bf16.mxu1 %v2676_v31  ;;  %2029 = vmatpush1.bf16.msra.mxu0 %v2761_v42  ;;  %v2722_v31 = vld [vmem:[#allocation6 + $0x4c8] ss:$16 sps:$4 sm:$0xff]  }
  0xcf   :  { %2030 = vmatprep.subr.bf16.mxu0 %v2766_v44  ;;  %v2800_v42 = vld [vmem:[#allocation8 + $0xf0] ss:$8 sps:$4 sm:$0xff]   ;;  %v2739_v44 = vld [vmem:[#allocation6 + $0x56c] ss:$16 sps:$4 sm:$0xff]  }
  0xd1   :  { %1502 = vmatpush1.bf16.msra.mxu1 %v2674_v52  ;;  %v2727_v52 = vld [vmem:[#allocation6 + $0x4ec] ss:$16 sps:$4 sm:$0xff]  }
  0xd2   :  { %1503 = vmatprep.subr.bf16.mxu1 %v2679_v32  ;;  %2031 = vmatpush1.bf16.msra.mxu0 %v2764_v46  ;;  %v2725_v32 = vld [vmem:[#allocation6 + $0x4e8] ss:$16 sps:$4 sm:$0xff]   ;;  %v2805_v46 = vld [vmem:[#allocation8 + $0x104] ss:$8 sps:$4 sm:$0xff]  }
  0xd3   :  { %2032 = vmatprep.subr.bf16.mxu0 %v2769_v48  ;;  %v2740_v48 = vld [vmem:[#allocation6 + $0x588] ss:$16 sps:$4 sm:$0xff]  }
  0xd5   :  { %1504 = vmatpush1.bf16.msra.mxu1 %v2677_v37  ;;  %v2799_v37 = vld [vmem:[#allocation8 + $0xe4] ss:$8 sps:$4 sm:$0xff]  }
  0xd6   :  { %1505 = vmatprep.subr.bf16.mxu1 %v2682_v39  ;;  %2033 = vmatpush1.bf16.msra.mxu0 %v2767_v50  ;;  %v2731_v39 = vld [vmem:[#allocation6 + $0x528] ss:$16 sps:$4 sm:$0xff]  }
  0xd7   :  { %2034 = vmatprep.subr.bf16.mxu0 %v2772_v53  ;;  %v2743_v50 = vld [vmem:[#allocation6 + $0x5a8] ss:$16 sps:$4 sm:$0xff]  }
  0xd8   :  { %v2746_v53 = vld [vmem:[#allocation6 + $0x5c8] ss:$16 sps:$4 sm:$0xff]  }
  0xd9   :  { %1506 = vmatpush1.bf16.msra.mxu1 %v2680_v41  ;;  %v2802_v41 = vld [vmem:[#allocation8 + $0xf4] ss:$8 sps:$4 sm:$0xff]  }
  0xda   :  { %1507 = vmatprep.subr.bf16.mxu1 %v2685_v43  ;;  %2035 = vmatpush1.bf16.msra.mxu0 %v2770_v55  ;;  %v2734_v43 = vld [vmem:[#allocation6 + $0x548] ss:$16 sps:$4 sm:$0xff]  }
  0xdb   :  { %2036 = vmatprep.subr.bf16.mxu0 %v2775_v57  ;;  %v2749_v55 = vld [vmem:[#allocation6 + $0x5e8] ss:$16 sps:$4 sm:$0xff]  }
  0xdc   :  { %v2752_v57 = vld [vmem:[#allocation6 + $0x608] ss:$16 sps:$4 sm:$0xff]  }
  0xdd   :  { %1508 = vmatpush1.bf16.msra.mxu1 %v2683_v45  ;;  %v2737_v45 = vld [vmem:[#allocation6 + $0x568] ss:$16 sps:$4 sm:$0xff]  }
  0xde   :  { %1509 = vmatprep.subr.bf16.mxu1 %v2688_v47  ;;  %2037 = vmatpush1.bf16.msra.mxu0 %v2773_v59  ;;  %v2742_v47 = vld [vmem:[#allocation6 + $0x58c] ss:$16 sps:$4 sm:$0xff]  }
  0xdf   :  { %2038 = vmatprep.subr.bf16.mxu0 %v2778_v61 }
  0xe1   :  { %1510 = vmatpush1.bf16.msra.mxu1 %v2686_v49  ;;  %v2745_v49 = vld [vmem:[#allocation6 + $0x5ac] ss:$16 sps:$4 sm:$0xff]  }
  0xe2   :  { %1511 = vmatprep.subr.bf16.mxu1 %v2691_v51  ;;  %2039 = vmatpush1.bf16.msra.mxu0 %v2776_v63  ;;  %v2748_v51 = vld [vmem:[#allocation6 + $0x5cc] ss:$16 sps:$4 sm:$0xff]  }
  0xe3   :  { %2040 = vmatprep.subr.bf16.mxu0 %v2781_v1 }
  0xe5   :  { %1512 = vmatpush1.bf16.msra.mxu1 %v2689_v54  ;;  %v2751_v54 = vld [vmem:[#allocation6 + $0x5ec] ss:$16 sps:$4 sm:$0xff]  }
  0xe6   :  { %1513 = vmatprep.subr.bf16.mxu1 %v2694_v56  ;;  %2041 = vmatpush1.bf16.msra.mxu0 %v2779_v3  ;;  %v2754_v56 = vld [vmem:[#allocation6 + $0x60c] ss:$16 sps:$4 sm:$0xff]  }
  0xe7   :  { %2042 = vmatprep.subr.bf16.mxu0 %v2784_v5 }
  0xe9   :  { %1514 = vmatpush1.bf16.msra.mxu1 %v2692_v58 }
  0xea   :  { %1515 = vmatprep.subr.bf16.mxu1 %v2697_v60  ;;  %2043 = vmatpush1.bf16.msra.mxu0 %v2782_v7 }
  0xeb   :  { %2044 = vmatprep.subr.bf16.mxu0 %v2787_v10 }
  0xed   :  { %1516 = vmatpush1.bf16.msra.mxu1 %v2695_v62  ;;  %v280_v62 = vlaneseq }
  0xee   :  { %1517 = vmatprep.subr.bf16.mxu1 %v2700_v0  ;;  %2045 = vmatpush1.bf16.msra.mxu0 %v2785_v14 }
  0xef   :  { %2046 = vmatprep.subr.bf16.mxu0 %v2790_v15  ;;  %v3063_v63 = vshrl.u32 %v280_v62, 7 }
  0xf1   :  { %1518 = vmatpush1.bf16.msra.mxu1 %v2698_v2  ;;  %v3066_v0 = vsub.s32 0, %v3063_v63 }
  0xf2   :  { %1519 = vmatprep.subr.bf16.mxu1 %v2703_v4  ;;  %2047 = vmatpush1.bf16.msra.mxu0 %v2788_v19 }
  0xf3   :  { %2048 = vmatprep.subr.bf16.mxu0 %v2793_v20  ;;  %v2808_v20 = vld [vmem:[#allocation8 + $0x114] ss:$8 sps:$4 sm:$0xff]  }
  0xf5   :  { %1520 = vmatpush1.bf16.msra.mxu1 %v2701_v6 }
  0xf6   :  { %1530 = vmatprep.subr.bf16.mxu1 %v2706_v9  ;;  %2049 = vmatpush1.bf16.msra.mxu0 %v2791_v24  ;;  %v2809_v24 = vld [vmem:[#allocation8 + $0x120] ss:$8 sps:$4 sm:$0xff]  }
  0xf7   :  { %2050 = vmatprep.subr.bf16.mxu0 %v2796_v25  ;;  %v2814_v25 = vld [vmem:[#allocation8 + $0x134] ss:$8 sps:$4 sm:$0xff]  }
  0xf8   :  { %1522 = vmatmul.mubr.bf16.vlgmr.msra.gmra.mrb[4].mxu1 %v3038_v11  ;;  %v2713_v11 = vld [vmem:[#allocation6 + $0x468] ss:$16 sps:$4 sm:$0xff]  }
  0xf9   :  { %1531 = vmatpush1.bf16.msra.mxu1 %v2704_v12  ;;  %1562 = vmatprep.mubr.bf16.mxu1 %v3043_v35  ;;  %v2794_v35 = vld [vmem:[#allocation8 + $0xd0] ss:$8 sps:$4 sm:$0xff]  }
  0xfa   :  { %1532 = vmatprep.subr.bf16.mxu1 %v2709_v13  ;;  %2051 = vmatpush1.bf16.msra.mxu0 %v2794_v35  ;;  %v2815_v35 = vld [vmem:[#allocation8 + $0x140] ss:$8 sps:$4 sm:$0xff]  }
  0xfb   :  { %2052 = vmatprep.subr.bf16.mxu0 %v2799_v37  ;;  %v2835_v37 = vld [vmem:[#allocation8 + $0x1a4] ss:$8 sps:$4 sm:$0xff]  }
  0xfd   :  { %1533 = vmatpush1.bf16.msra.mxu1 %v2707_v17 }
  0xfe   :  { %1534 = vmatprep.subr.bf16.mxu1 %v2712_v18  ;;  %2053 = vmatpush1.bf16.msra.mxu0 %v2797_v38  ;;  %v2803_v18 = vld [vmem:[#allocation8 + $0x100] ss:$8 sps:$4 sm:$0xff]  }
  0xff   :  { %2054 = vmatprep.subr.bf16.mxu0 %v2802_v41  ;;  %v2833_v38 = vld [vmem:[#allocation8 + $0x1a0] ss:$8 sps:$4 sm:$0xff]   ;;  %v2841_v41 = vld [vmem:[#allocation8 + $0x1c4] ss:$8 sps:$4 sm:$0xff]  }
 0x101   :  { %1535 = vmatpush1.bf16.msra.mxu1 %v2710_v21  ;;  %v2806_v21 = vld [vmem:[#allocation8 + $0x110] ss:$8 sps:$4 sm:$0xff]  }
 0x102   :  { %1536 = vmatprep.subr.bf16.mxu1 %v2715_v23  ;;  %2055 = vmatpush1.bf16.msra.mxu0 %v2800_v42  ;;  %v2811_v23 = vld [vmem:[#allocation8 + $0x124] ss:$8 sps:$4 sm:$0xff]   ;;  %v2839_v42 = vld [vmem:[#allocation8 + $0x1c0] ss:$8 sps:$4 sm:$0xff]  }
 0x103   :  { %2065 = vmatprep.subr.bf16.mxu0 %v2805_v46  ;;  %v2845_v46 = vld [vmem:[#allocation8 + $0x1e0] ss:$8 sps:$4 sm:$0xff]  }
 0x105   :  { %1537 = vmatpush1.bf16.msra.mxu1 %v2713_v11  ;;  %v2812_v11 = vld [vmem:[#allocation8 + $0x130] ss:$8 sps:$4 sm:$0xff]  }
 0x106   :  { %1538 = vmatprep.subr.bf16.mxu1 %v2718_v26  ;;  %v2817_v26 = vld [vmem:[#allocation8 + $0x144] ss:$8 sps:$4 sm:$0xff]  }
 0x109   :  { %1539 = vmatpush1.bf16.msra.mxu1 %v2716_v28  ;;  %v2820_v28 = vld [vmem:[#allocation8 + $0x154] ss:$8 sps:$4 sm:$0xff]  }
 0x10a   :  { %1540 = vmatprep.subr.bf16.mxu1 %v2721_v8  ;;  %v2818_v8 = vld [vmem:[#allocation8 + $0x150] ss:$8 sps:$4 sm:$0xff]  }
 0x10d   :  { %1541 = vmatpush1.bf16.msra.mxu1 %v2719_v29  ;;  %v2823_v29 = vld [vmem:[#allocation8 + $0x164] ss:$8 sps:$4 sm:$0xff]  }
 0x10e   :  { %1542 = vmatprep.subr.bf16.mxu1 %v2724_v30  ;;  %v2821_v30 = vld [vmem:[#allocation8 + $0x160] ss:$8 sps:$4 sm:$0xff]  }
 0x111   :  { %1543 = vmatpush1.bf16.msra.mxu1 %v2722_v31  ;;  %v2826_v31 = vld [vmem:[#allocation8 + $0x174] ss:$8 sps:$4 sm:$0xff]  }
 0x112   :  { %1544 = vmatprep.subr.bf16.mxu1 %v2727_v52  ;;  %v2824_v52 = vld [vmem:[#allocation8 + $0x170] ss:$8 sps:$4 sm:$0xff]  }
 0x115   :  { %1545 = vmatpush1.bf16.msra.mxu1 %v2725_v32  ;;  %v2829_v32 = vld [vmem:[#allocation8 + $0x184] ss:$8 sps:$4 sm:$0xff]  }
 0x116   :  { %1546 = vmatprep.subr.bf16.mxu1 %v2730_v33  ;;  %v2827_v33 = vld [vmem:[#allocation8 + $0x180] ss:$8 sps:$4 sm:$0xff]  }
 0x119   :  { %1547 = vmatpush1.bf16.msra.mxu1 %v2728_v34  ;;  %v2832_v34 = vld [vmem:[#allocation8 + $0x194] ss:$8 sps:$4 sm:$0xff]  }
 0x11a   :  { %1548 = vmatprep.subr.bf16.mxu1 %v2733_v36  ;;  %v2830_v36 = vld [vmem:[#allocation8 + $0x190] ss:$8 sps:$4 sm:$0xff]  }
 0x11d   :  { %1549 = vmatpush1.bf16.msra.mxu1 %v2731_v39  ;;  %v2838_v39 = vld [vmem:[#allocation8 + $0x1b4] ss:$8 sps:$4 sm:$0xff]  }
 0x11e   :  { %1550 = vmatprep.subr.bf16.mxu1 %v2736_v40  ;;  %v2836_v40 = vld [vmem:[#allocation8 + $0x1b0] ss:$8 sps:$4 sm:$0xff]  }
 0x121   :  { %1551 = vmatpush1.bf16.msra.mxu1 %v2734_v43  ;;  %v2844_v43 = vld [vmem:[#allocation8 + $0x1d4] ss:$8 sps:$4 sm:$0xff]  }
 0x122   :  { %1552 = vmatprep.subr.bf16.mxu1 %v2739_v44  ;;  %v2842_v44 = vld [vmem:[#allocation8 + $0x1d0] ss:$8 sps:$4 sm:$0xff]  }
 0x125   :  { %1553 = vmatpush1.bf16.msra.mxu1 %v2737_v45  ;;  %v2847_v45 = vld [vmem:[#allocation8 + $0x1e4] ss:$8 sps:$4 sm:$0xff]  }
 0x126   :  { %1554 = vmatprep.subr.bf16.mxu1 %v2742_v47  ;;  %v2850_v47 = vld [vmem:[#allocation8 + $0x1f4] ss:$8 sps:$4 sm:$0xff]  }
 0x129   :  { %1555 = vmatpush1.bf16.msra.mxu1 %v2740_v48  ;;  %v2848_v48 = vld [vmem:[#allocation8 + $0x1f0] ss:$8 sps:$4 sm:$0xff]  }
 0x12a   :  { %1556 = vmatprep.subr.bf16.mxu1 %v2745_v49  ;;  %v290_v49 = vsub.s32 2, %v3063_v63 }
 0x12d   :  { %1557 = vmatpush1.bf16.msra.mxu1 %v2743_v50  ;;  %v294_v50 = vsub.s32 3, %v3063_v63 }
 0x12e   :  { %1558 = vmatprep.subr.bf16.mxu1 %v2748_v51 }
 0x131   :  { %1559 = vmatpush1.bf16.msra.mxu1 %v2746_v53 }
 0x132   :  { %1560 = vmatprep.subr.bf16.mxu1 %v2751_v54 }
 0x135   :  { %1561 = vmatpush1.bf16.msra.mxu1 %v2749_v55 }
 0x136   :  { %1571 = vmatprep.subr.bf16.mxu1 %v2754_v56 }
 0x138   :  { %1563 = vmatmul.mubr.bf16.vlgmr.msra.gmra.mrb[4].mxu1 %v3046_v16  ;;  %v3071_v16 = vld [vmem:[%s3113_s2] sm:$0xf] }
 0x139   :  { %1572 = vmatpush1.bf16.msra.mxu1 %v2752_v57  ;;  %1603 = vmatprep.mubr.bf16.mxu1 %v2952_v22  ;;  %v3074_v22 = vsub.s32 1, %v3063_v63  ;;  %v291_v51 = vrot.slane %v3071_v16, %v290_v49  ;;  %v295_v53 = vrot.slane %v3071_v16, %v294_v50 }
 0x13b   :  { %v287_v1 = vrot.slane %v3071_v16, %v3074_v22 }
 0x144   :  { %2355 = vmatmul.mubr.msk.bf16.vlgmr.msra.gmra.mrb[4].mxu1 %vm1280_vm0, %v3052_v27  ;;  %v283_v27 = vrot.slane %v3071_v16, %v3066_v0  ;;  %v1692_v16 = vld [vmem:[%s3115_s4] sm:$0x3] }
 0x14b   :  { %v1318_v58 = vpop.f32.mrb[0].mxu1 }
 0x14c   :  { %v1320_v59 = vpop.f32.mrb[1].mxu1  ;;  %v1319_v2 = vadd.f32 %v1318_v58, %v283_v27 }
 0x14d   :  { %v1322_v60 = vpop.f32.mrb[2].mxu1  ;;  %v1321_v3 = vadd.f32 %v1320_v59, %v287_v1 }
 0x14e   :  { %v1323_v61 = vpop.f32.mrb[3].mxu1 }
 0x198   :  { %v1441_v4 = vpop.f32.mrb[0].mxu0 }
 0x199   :  { %v2421_v5 = vadd.f32 %v1441_v4, %v1319_v2  ;;  %v1443_v6 = vpop.f32.mrb[1].mxu0  ;;  %v1697_v4 = vrot.slane %v1692_v16, %v3066_v0 }
 0x19a   :  { %v2423_v7 = vadd.f32 %v1443_v6, %v1321_v3  ;;  %v1445_v9 = vpop.f32.mrb[2].mxu0  ;;  %v2112_v6 = vld [vmem:[%s3116_s5] sm:$0x3] }
 0x19b   :  { %vm1612_vm1 = vcmp.gt.f32.partialorder %v2421_v5, 0.0  ;;  %v1616_v10 = vmul.f32 0.2, %v2421_v5  ;;  %v1446_v12 = vpop.f32.mrb[3].mxu0 }
 0x19c   :  { %vm1613_vm2 = vcmp.gt.f32.partialorder %v2423_v7, 0.0  ;;  %v1617_v13 = vmul.f32 0.2, %v2423_v7 }
 0x19d   :  { %v1620_v14 = vsel %vm1612_vm1, %v2421_v5, %v1616_v10  ;;  %v1701_v5 = vrot.slane %v1692_v16, %v3074_v22 }
 0x19e   :  { %v1621_v15 = vsel %vm1613_vm2, %v2423_v7, %v1617_v13  ;;  %v1624_v19 = vpack.c.bf16 %v1620_v14, %v1620_v14  ;;  %v2117_v14 = vrot.slane %v2112_v6, %v3066_v0 }
 0x19f   :  { %v1625_v17 = vpack.c.bf16 %v1621_v15, %v1621_v15 }
 0x1a1   :  { %2056 = vmatprep.mubr.bf16.mxu0 %v1625_v17 }
 0x1a2   :  { %2057 = vmatmul.mubr.bf16.vlgmr.msra.gmra.mrb[4].mxu0 %v1624_v19 }
 0x1a3   :  { %2066 = vmatpush1.bf16.msra.mxu0 %v2803_v18  ;;  %v2121_v18 = vrot.slane %v2112_v6, %v3074_v22 }
 0x1a4   :  { %2067 = vmatprep.subr.bf16.mxu0 %v2808_v20 }
 0x1a7   :  { %2068 = vmatpush1.bf16.msra.mxu0 %v2806_v21 }
 0x1a8   :  { %2069 = vmatprep.subr.bf16.mxu0 %v2811_v23 }
 0x1ab   :  { %2070 = vmatpush1.bf16.msra.mxu0 %v2809_v24 }
 0x1ac   :  { %2071 = vmatprep.subr.bf16.mxu0 %v2814_v25 }
 0x1af   :  { %2072 = vmatpush1.bf16.msra.mxu0 %v2812_v11  ;;  %v2134_v11 = vand.u32 127, %v280_v62 }
 0x1b0   :  { %2073 = vmatprep.subr.bf16.mxu0 %v2817_v26  ;;  %v2130_v26 = vstv %s3117_s6 }
 0x1b1   :  { %v2137_v0 = vsub.s32 %v2134_v11, %v3063_v63 }
 0x1b3   :  { %2074 = vmatpush1.bf16.msra.mxu0 %v2815_v35 }
 0x1b4   :  { %2075 = vmatprep.subr.bf16.mxu0 %v2820_v28 }
 0x1b7   :  { %2076 = vmatpush1.bf16.msra.mxu0 %v2818_v8 }
 0x1b8   :  { %2077 = vmatprep.subr.bf16.mxu0 %v2823_v29 }
 0x1bb   :  { %2078 = vmatpush1.bf16.msra.mxu0 %v2821_v30 }
 0x1bc   :  { %2079 = vmatprep.subr.bf16.mxu0 %v2826_v31 }
 0x1bf   :  { %2080 = vmatpush1.bf16.msra.mxu0 %v2824_v52 }
 0x1c0   :  { %2081 = vmatprep.subr.bf16.mxu0 %v2829_v32 }
 0x1c3   :  { %2082 = vmatpush1.bf16.msra.mxu0 %v2827_v33 }
 0x1c4   :  { %2083 = vmatprep.subr.bf16.mxu0 %v2832_v34 }
 0x1c7   :  { %2084 = vmatpush1.bf16.msra.mxu0 %v2830_v36 }
 0x1c8   :  { %2085 = vmatprep.subr.bf16.mxu0 %v2835_v37 }
 0x1cb   :  { %2086 = vmatpush1.bf16.msra.mxu0 %v2833_v38 }
 0x1cc   :  { %2087 = vmatprep.subr.bf16.mxu0 %v2838_v39 }
 0x1cf   :  { %2088 = vmatpush1.bf16.msra.mxu0 %v2836_v40 }
 0x1d0   :  { %2089 = vmatprep.subr.bf16.mxu0 %v2841_v41 }
 0x1d3   :  { %2090 = vmatpush1.bf16.msra.mxu0 %v2839_v42 }
 0x1d4   :  { %2091 = vmatprep.subr.bf16.mxu0 %v2844_v43 }
 0x1d7   :  { %2092 = vmatpush1.bf16.msra.mxu0 %v2842_v44 }
 0x1d8   :  { %2093 = vmatprep.subr.bf16.mxu0 %v2847_v45 }
 0x1db   :  { %2094 = vmatpush1.bf16.msra.mxu0 %v2845_v46 }
 0x1dc   :  { %2095 = vmatprep.subr.bf16.mxu0 %v2850_v47 }
 0x1df   :  { %2096 = vmatpush1.bf16.msra.mxu0 %v2848_v48 }
 0x217   :  { %v1605_v54 = vpop.f32.mrb[4].mxu1 }
 0x218   :  { %v2424_v55 = vadd.f32 %v1605_v54, %v291_v51  ;;  %v1607_v56 = vpop.f32.mrb[5].mxu1 }
 0x219   :  { %v2425_v57 = vadd.f32 %v1607_v56, %v295_v53  ;;  %v1609_v58 = vpop.f32.mrb[6].mxu1 }
 0x21a   :  { %vm1614_vm3 = vcmp.gt.f32.partialorder %v2424_v55, 0.0  ;;  %v1618_v59 = vmul.f32 0.2, %v2424_v55  ;;  %v1610_v60 = vpop.f32.mrb[7].mxu1 }
 0x21b   :  { %vm1615_vm4 = vcmp.gt.f32.partialorder %v2425_v57, 0.0  ;;  %v1619_v61 = vmul.f32 0.2, %v2425_v57 }
 0x21c   :  { %v1622_v27 = vsel %vm1614_vm3, %v2424_v55, %v1618_v59 }
 0x21d   :  { %v1623_v1 = vsel %vm1615_vm4, %v2425_v57, %v1619_v61  ;;  %v1626_v3 = vpack.c.bf16 %v1622_v27, %v1622_v27 }
 0x21e   :  { %v1627_v2 = vpack.c.bf16 %v1623_v1, %v1623_v1 }
 0x220   :  { %2097 = vmatprep.mubr.bf16.mxu0 %v1627_v2 }
 0x221   :  { %2098 = vmatmul.mubr.bf16.vlgmr.msra.gmra.mrb[4].mxu0 %v1626_v3 }
 0x2f4   :  { %v2099_v7 = vpop.f32.mrb[4].mxu0 }
 0x2f5   :  { %v2426_v9 = vadd.f32 %v2099_v7, %v1697_v4  ;;  %v2101_v10 = vpop.f32.mrb[5].mxu0 }
 0x2f6   :  { %v2427_v12 = vadd.f32 %v2101_v10, %v1701_v5  ;;  %v2103_v13 = vpop.f32.mrb[6].mxu0 }
 0x2f7   :  { %vm2106_vm5 = vcmp.gt.f32.partialorder %v2426_v9, 0.0  ;;  %v2108_v15 = vmul.f32 0.2, %v2426_v9  ;;  %v2104_v17 = vpop.f32.mrb[7].mxu0 }
 0x2f8   :  { %vm2107_vm6 = vcmp.gt.f32.partialorder %v2427_v12, 0.0  ;;  %v2109_v19 = vmul.f32 0.2, %v2427_v12 }
 0x2f9   :  { %v2110_v20 = vsel %vm2106_vm5, %v2426_v9, %v2108_v15 }
 0x2fa   :  { %v2111_v21 = vsel %vm2107_vm6, %v2427_v12, %v2109_v19  ;;  %v2124_v23 = vmul.f32 %v2117_v14, %v2110_v20 }
 0x2fb   :  { %v2125_v24 = vmul.f32 %v2121_v18, %v2111_v21 }
 0x2fd   :  { %v2126_v25 = vadd.f32 %v2125_v24, %v2124_v23 }
 0x2ff   :  { %2127 = vadd.xlane.f32.xlu0 %v2126_v25 }
 0x38c   :  { %v2128_v35 = vpop.xlane.xlu0 %2127 }
 0x38d   :  { %v2131_v22 = vadd.f32 %v2130_v26, %v2128_v35 }
 0x38f   :  { %v2138_v28 = vrot.slane %v2131_v22, %v2137_v0 }
 0x391   :  { %2141 = vst.msk [vmem:[#allocation9] sm:$0x1] %vm2140_vm7, %v2138_v28 }
 0x392   :  { %2928 = shalt.err (!%p2925_p0)
}
 0x393   :  { %s2929_s26 = scalar_lea.hbm %s3118_s7, 16 }
 0x394   :  { %p2930_p1 = scmp.ne.s32.totalorder %s3118_s7, %s2929_s26  ;;  %p2933_p2 = scmp.lt.u32.totalorder %s2929_s26, %s3118_s7 }
 0x396   :  { %p2935_p3 = pnand %p2933_p2, %p2930_p1 }
 0x398   :  { %2938 = shalt.err (!%p2935_p3)
}
 0x399   :  { %2151 = dma.vmem_to_hbm [thread:$0]  %s2149_s21, 16, %s3118_s7, [#allocation5]  }
 0x39a   :  { %2943 = dma.done.wait [#allocation5], 16  }
 0x39b   :  { %2944 = vsyncadd [#allocation5], 4294967280 }
 0x39c   :  { %2155 = vsyncpa [#allocation4], 1 }
 0x39d   :  { %2156 = vsyncpa [#allocation7], 1 }
 0x39e   :  { %2157 = vsyncpa [#allocation5], 1 }

// kernel: tpu_custom_call.1
= control target key start
LH: loop header
LB: loop body
LE: loop exit
PB: predicated region body
PF: predicated region fallthrough
CT: control target
= control target key end

     0   :  { %13 = vsyncpa [#allocation4], 0  ;;  %s3111_s0 = inlined_call_operand.hbm [shape: f32[8,784], index: 0, kind: input, shape index: {}]   ;;  %s3112_s1 = inlined_call_operand.hbm [shape: bf16[784,512], index: 1, kind: input, shape index: {}]   ;;  %s3113_s2 = inlined_call_operand.vmem [shape: f32[1,512], index: 2, kind: input, shape index: {}]   ;;  %s3114_s3 = inlined_call_operand.hbm [shape: bf16[512,256], index: 3, kind: input, shape index: {}]   ;;  %s3115_s4 = inlined_call_operand.vmem [shape: f32[1,256], index: 4, kind: input, shape index: {}]   ;;  %s3116_s5 = inlined_call_operand.vmem [shape: f32[1,256], index: 5, kind: input, shape index: {}]   ;;  %s3117_s6 = inlined_call_operand.<no memory space> [shape: f32[1], index: 6, kind: input, shape index: {}]   ;;  %s3118_s7 = inlined_call_operand.hbm [shape: f32[1,8], index: 7, kind: output, shape index: {}]  }
   0x1   :  { %14 = vsyncpa [#allocation7], 0 }
   0x2   :  { %15 = vsyncpa [#allocation5], 0  ;;  %s2945_s24 = smov [#allocation6]   ;;  %s2851_s28 = scalar_lea.hbm %s3112_s1, 25088 }
   0x3   :  { %s31_s25 = sshll.u32 %s2945_s24, 4  ;;  %p2852_p0 = scmp.ne.s32.totalorder %s3112_s1, %s2851_s28  ;;  %s32_s25 = int_to_ptr.vmem [resolvable:$true] %s31_s25 }
   0x4   :  { %p2855_p1 = scmp.lt.u32.totalorder %s2851_s28, %s3112_s1 }
   0x6   :  { %p2857_p2 = pnand %p2855_p1, %p2852_p0 }
   0x8   :  { %2860 = shalt.err (!%p2857_p2)
}
   0x9   :  { %s2861_s10 = scalar_lea.vmem %s32_s25, 25088  ;;  %p2866_p4 = scmp.lt.s32.totalorder %s32_s25, %s32_s25 }
   0xa   :  { %p2862_p3 = scmp.ne.s32.totalorder %s32_s25, %s2861_s10  ;;  %p2867_p5 = scmp.lt.s32.totalorder %s2861_s10, %s2861_s10 }
   0xc   :  { %p2868_p6 = por %p2867_p5, %p2866_p4 }
   0xe   :  { %p2869_p7 = pnand %p2868_p6, %p2862_p3 }
  0x10   :  { %2872 = shalt.err (!%p2869_p7)
}
  0x11   :  { %s2946_s11 = smov 256   ;;  %s2947_s12 = smov 16  }
  0x12   :  { %37 = dma.hbm_to_vmem [thread:$0]  %s3112_s1, 25088, %s32_s25, [#allocation7], %s2946_s11, %s2946_s11, %s2947_s12  }
  0x13   :  { %s2948_s15 = smov [#allocation3]   ;;  %s2949_s17 = smov [#allocation8]  }
  0x14   :  { %s22_s16 = sshll.u32 %s2948_s15, 4  ;;  %s45_s18 = sshll.u32 %s2949_s17, 4  ;;  %s23_s16 = int_to_ptr.vmem [resolvable:$true] %s22_s16  ;;  %s46_s18 = int_to_ptr.vmem [resolvable:$true] %s45_s18 }
  0x15   :  { %s2873_s21 = scalar_lea.hbm %s3111_s0, 896 }
  0x16   :  { %p2874_p8 = scmp.ne.s32.totalorder %s3111_s0, %s2873_s21  ;;  %p2877_p9 = scmp.lt.u32.totalorder %s2873_s21, %s3111_s0 }
  0x18   :  { %p2879_p10 = pnand %p2877_p9, %p2874_p8 }
  0x1a   :  { %2882 = shalt.err (!%p2879_p10)
}
  0x1b   :  { %s2883_s1 = scalar_lea.vmem %s23_s16, 896  ;;  %p2888_p12 = scmp.lt.s32.totalorder %s23_s16, %s23_s16 }
  0x1c   :  { %p2884_p11 = scmp.ne.s32.totalorder %s23_s16, %s2883_s1  ;;  %p2889_p13 = scmp.lt.s32.totalorder %s2883_s1, %s2883_s1 }
  0x1e   :  { %p2890_p0 = por %p2889_p13, %p2888_p12 }
  0x20   :  { %p2891_p1 = pnand %p2890_p0, %p2884_p11 }
  0x22   :  { %2894 = shalt.err (!%p2891_p1)
}
  0x23   :  { %25 = dma.hbm_to_vmem [thread:$0]  %s3111_s0, 896, %s23_s16, [#allocation4]  }
  0x24   :  { %s2895_s30 = scalar_lea.hbm %s3114_s3, 8192 }
  0x25   :  { %p2896_p2 = scmp.ne.s32.totalorder %s3114_s3, %s2895_s30  ;;  %p2899_p3 = scmp.lt.u32.totalorder %s2895_s30, %s3114_s3 }
  0x27   :  { %p2901_p4 = pnand %p2899_p3, %p2896_p2 }
  0x29   :  { %2904 = shalt.err (!%p2901_p4)
}
  0x2a   :  { %s2905_s12 = scalar_lea.vmem %s46_s18, 8192  ;;  %p2910_p6 = scmp.lt.s32.totalorder %s46_s18, %s46_s18 }
  0x2b   :  { %p2906_p5 = scmp.ne.s32.totalorder %s46_s18, %s2905_s12  ;;  %p2911_p7 = scmp.lt.s32.totalorder %s2905_s12, %s2905_s12 }
  0x2d   :  { %p2912_p8 = por %p2911_p7, %p2910_p6 }
  0x2f   :  { %p2913_p9 = pnand %p2912_p8, %p2906_p5 }
  0x31   :  { %2916 = shalt.err (!%p2913_p9)
}
  0x32   :  { %s2950_s0 = smov 128   ;;  %s2951_s13 = smov 8  }
  0x33   :  { %51 = dma.hbm_to_vmem [thread:$0]  %s3114_s3, 8192, %s46_s18, [#allocation7], %s2950_s0, %s2950_s0, %s2951_s13  }
  0x34   :  { %2939 = dma.done.wait [#allocation4], 896  }
  0x35   :  { %2940 = vsyncadd [#allocation4], 4294966400 }
  0x36   :  { %2941 = dma.done.wait [#allocation7], 33280  }
  0x37   :  { %2942 = vsyncadd [#allocation7], 4294934016  ;;  %v2461_v0 = vld [vmem:[#allocation6 + $0x4] ss:$16 sps:$4 sm:$0xff]   ;;  %v2465_v2 = vld [vmem:[#allocation6] ss:$16 sps:$4 sm:$0xff]  }
  0x38   :  { %v2463_v1 = vld [vmem:[#allocation6 + $0x204] ss:$16 sps:$4 sm:$0xff]   ;;  %1284 = vmatprep.subr.bf16.mxu1 %v2461_v0  ;;  %v2466_v3 = vld [vmem:[#allocation6 + $0x200] ss:$16 sps:$4 sm:$0xff]   ;;  %vm1280_vm0 = vcmask 130048   ;;  %s2953_s20 = smov [#allocation9]  }
  0x39   :  { %1325 = vmatprep.subr.bf16.mxu0 %v2463_v1  ;;  %v2467_v4 = vld [vmem:[#allocation6 + $0x24] ss:$16 sps:$4 sm:$0xff]   ;;  %1285 = vmatpush1.bf16.msra.mxu1 %v2465_v2  ;;  %v2471_v6 = vld [vmem:[#allocation6 + $0x20] ss:$16 sps:$4 sm:$0xff]   ;;  %s2148_s21 = sshll.u32 %s2953_s20, 4  ;;  %vm2140_vm7 = vcmask 57344   ;;  %s2149_s21 = int_to_ptr.vmem [resolvable:$true] %s2148_s21 }
  0x3a   :  { %1326 = vmatpush1.bf16.msra.mxu0 %v2466_v3  ;;  %v2469_v5 = vld [vmem:[#allocation6 + $0x224] ss:$16 sps:$4 sm:$0xff]   ;;  %1286 = vmatprep.subr.bf16.mxu1 %v2467_v4  ;;  %v2472_v7 = vld [vmem:[#allocation6 + $0x220] ss:$16 sps:$4 sm:$0xff]   ;;  %v68_v4 = vld [vmem:[#allocation3] sm:$0xff]  ;;  %s2917_s22 = scalar_lea.vmem %s2149_s21, 16  ;;  %p2922_p11 = scmp.lt.s32.totalorder %s2149_s21, %s2149_s21 }
  0x3b   :  { %1327 = vmatprep.subr.bf16.mxu0 %v2469_v5  ;;  %v2473_v8 = vld [vmem:[#allocation6 + $0x44] ss:$16 sps:$4 sm:$0xff]   ;;  %v2477_v10 = vld [vmem:[#allocation6 + $0x40] ss:$16 sps:$4 sm:$0xff]   ;;  %p2918_p10 = scmp.ne.s32.totalorder %s2149_s21, %s2917_s22  ;;  %s2921_s23 = scalar_lea.vmem %s2149_s21, 32 }
  0x3c   :  { %v2475_v9 = vld [vmem:[#allocation6 + $0x244] ss:$16 sps:$4 sm:$0xff]   ;;  %v2478_v11 = vld [vmem:[#allocation6 + $0x240] ss:$16 sps:$4 sm:$0xff]   ;;  %p2923_p12 = scmp.lt.s32.totalorder %s2921_s23, %s2917_s22 }
  0x3d   :  { %1287 = vmatpush1.bf16.msra.mxu1 %v2471_v6  ;;  %v2479_v12 = vld [vmem:[#allocation6 + $0x64] ss:$16 sps:$4 sm:$0xff]   ;;  %v2483_v14 = vld [vmem:[#allocation6 + $0x60] ss:$16 sps:$4 sm:$0xff]   ;;  %v70_v6 = vld [vmem:[#allocation3 + $0x10] sm:$0xff] }
  0x3e   :  { %1328 = vmatpush1.bf16.msra.mxu0 %v2472_v7  ;;  %1288 = vmatprep.subr.bf16.mxu1 %v2473_v8  ;;  %v2481_v13 = vld [vmem:[#allocation6 + $0x264] ss:$16 sps:$4 sm:$0xff]   ;;  %v2484_v15 = vld [vmem:[#allocation6 + $0x260] ss:$16 sps:$4 sm:$0xff]   ;;  %v2562_v7 = vld [vmem:[#allocation6 + $0xc] ss:$16 sps:$4 sm:$0xff]   ;;  %v3036_v8 = vpack.c.bf16 %v68_v4, %v68_v4  ;;  %p2924_p13 = por %p2923_p12, %p2922_p11 }
  0x3f   :  { %1329 = vmatprep.subr.bf16.mxu0 %v2475_v9  ;;  %v2485_v16 = vld [vmem:[#allocation6 + $0x84] ss:$16 sps:$4 sm:$0xff]   ;;  %v2489_v18 = vld [vmem:[#allocation6 + $0x80] ss:$16 sps:$4 sm:$0xff]   ;;  %v2646_v4 = vld [vmem:[#allocation6 + $0x1cc] ss:$16 sps:$4 sm:$0xff]  }
  0x40   :  { %v2487_v17 = vld [vmem:[#allocation6 + $0x284] ss:$16 sps:$4 sm:$0xff]   ;;  %v2490_v19 = vld [vmem:[#allocation6 + $0x280] ss:$16 sps:$4 sm:$0xff]   ;;  %p2925_p0 = pnand %p2924_p13, %p2918_p10 }
  0x41   :  { %1289 = vmatpush1.bf16.msra.mxu1 %v2477_v10  ;;  %v2491_v20 = vld [vmem:[#allocation6 + $0xa4] ss:$16 sps:$4 sm:$0xff]   ;;  %v2495_v22 = vld [vmem:[#allocation6 + $0xa0] ss:$16 sps:$4 sm:$0xff]   ;;  %v2560_v10 = vld [vmem:[#allocation6 + $0x8] ss:$16 sps:$4 sm:$0xff]  }
  0x42   :  { %1330 = vmatpush1.bf16.msra.mxu0 %v2478_v11  ;;  %1290 = vmatprep.subr.bf16.mxu1 %v2479_v12  ;;  %v2493_v21 = vld [vmem:[#allocation6 + $0x2a4] ss:$16 sps:$4 sm:$0xff]   ;;  %v2496_v23 = vld [vmem:[#allocation6 + $0x2a0] ss:$16 sps:$4 sm:$0xff]   ;;  %v3038_v11 = vpack.c.bf16 %v70_v6, %v70_v6  ;;  %v2644_v6 = vld [vmem:[#allocation6 + $0x1c8] ss:$16 sps:$4 sm:$0xff]  }
  0x43   :  { %1331 = vmatprep.subr.bf16.mxu0 %v2481_v13  ;;  %v2497_v24 = vld [vmem:[#allocation6 + $0xc4] ss:$16 sps:$4 sm:$0xff]   ;;  %v2501_v26 = vld [vmem:[#allocation6 + $0xc0] ss:$16 sps:$4 sm:$0xff]   ;;  %v2568_v13 = vld [vmem:[#allocation6 + $0x2c] ss:$16 sps:$4 sm:$0xff]  }
  0x44   :  { %v2499_v25 = vld [vmem:[#allocation6 + $0x2c4] ss:$16 sps:$4 sm:$0xff]   ;;  %v2502_v27 = vld [vmem:[#allocation6 + $0x2c0] ss:$16 sps:$4 sm:$0xff]  }
  0x45   :  { %1291 = vmatpush1.bf16.msra.mxu1 %v2483_v14  ;;  %v2503_v28 = vld [vmem:[#allocation6 + $0xe4] ss:$16 sps:$4 sm:$0xff]   ;;  %v2507_v30 = vld [vmem:[#allocation6 + $0xe0] ss:$16 sps:$4 sm:$0xff]  }
  0x46   :  { %1332 = vmatpush1.bf16.msra.mxu0 %v2484_v15  ;;  %1292 = vmatprep.subr.bf16.mxu1 %v2485_v16  ;;  %v2505_v29 = vld [vmem:[#allocation6 + $0x2e4] ss:$16 sps:$4 sm:$0xff]   ;;  %v2508_v31 = vld [vmem:[#allocation6 + $0x2e0] ss:$16 sps:$4 sm:$0xff]   ;;  %v2566_v15 = vld [vmem:[#allocation6 + $0x28] ss:$16 sps:$4 sm:$0xff]  }
  0x47   :  { %1333 = vmatprep.subr.bf16.mxu0 %v2487_v17  ;;  %v2509_v32 = vld [vmem:[#allocation6 + $0x104] ss:$16 sps:$4 sm:$0xff]   ;;  %v2513_v34 = vld [vmem:[#allocation6 + $0x100] ss:$16 sps:$4 sm:$0xff]   ;;  %v2574_v17 = vld [vmem:[#allocation6 + $0x4c] ss:$16 sps:$4 sm:$0xff]  }
  0x48   :  { %v2511_v33 = vld [vmem:[#allocation6 + $0x304] ss:$16 sps:$4 sm:$0xff]   ;;  %v2514_v35 = vld [vmem:[#allocation6 + $0x300] ss:$16 sps:$4 sm:$0xff]  }
  0x49   :  { %1293 = vmatpush1.bf16.msra.mxu1 %v2489_v18  ;;  %v2515_v36 = vld [vmem:[#allocation6 + $0x124] ss:$16 sps:$4 sm:$0xff]   ;;  %v2519_v38 = vld [vmem:[#allocation6 + $0x120] ss:$16 sps:$4 sm:$0xff]  }
  0x4a   :  { %1334 = vmatpush1.bf16.msra.mxu0 %v2490_v19  ;;  %1294 = vmatprep.subr.bf16.mxu1 %v2491_v20  ;;  %v2517_v37 = vld [vmem:[#allocation6 + $0x324] ss:$16 sps:$4 sm:$0xff]   ;;  %v2520_v39 = vld [vmem:[#allocation6 + $0x320] ss:$16 sps:$4 sm:$0xff]   ;;  %v2572_v19 = vld [vmem:[#allocation6 + $0x48] ss:$16 sps:$4 sm:$0xff]  }
  0x4b   :  { %1335 = vmatprep.subr.bf16.mxu0 %v2493_v21  ;;  %v2521_v40 = vld [vmem:[#allocation6 + $0x144] ss:$16 sps:$4 sm:$0xff]   ;;  %v2525_v42 = vld [vmem:[#allocation6 + $0x140] ss:$16 sps:$4 sm:$0xff]   ;;  %v2580_v21 = vld [vmem:[#allocation6 + $0x6c] ss:$16 sps:$4 sm:$0xff]  }
  0x4c   :  { %v2523_v41 = vld [vmem:[#allocation6 + $0x344] ss:$16 sps:$4 sm:$0xff]   ;;  %v2526_v43 = vld [vmem:[#allocation6 + $0x340] ss:$16 sps:$4 sm:$0xff]  }
  0x4d   :  { %1295 = vmatpush1.bf16.msra.mxu1 %v2495_v22  ;;  %v2527_v44 = vld [vmem:[#allocation6 + $0x164] ss:$16 sps:$4 sm:$0xff]   ;;  %v2531_v47 = vld [vmem:[#allocation6 + $0x160] ss:$16 sps:$4 sm:$0xff]  }
  0x4e   :  { %1336 = vmatpush1.bf16.msra.mxu0 %v2496_v23  ;;  %1296 = vmatprep.subr.bf16.mxu1 %v2497_v24  ;;  %v2529_v45 = vld [vmem:[#allocation6 + $0x364] ss:$16 sps:$4 sm:$0xff]   ;;  %v2532_v50 = vld [vmem:[#allocation6 + $0x360] ss:$16 sps:$4 sm:$0xff]   ;;  %v2578_v23 = vld [vmem:[#allocation6 + $0x68] ss:$16 sps:$4 sm:$0xff]  }
  0x4f   :  { %1337 = vmatprep.subr.bf16.mxu0 %v2499_v25  ;;  %v69_v46 = vld [vmem:[#allocation3 + $0x8] sm:$0xff]  ;;  %v71_v49 = vld [vmem:[#allocation3 + $0x18] sm:$0xff]  ;;  %v2586_v25 = vld [vmem:[#allocation6 + $0x8c] ss:$16 sps:$4 sm:$0xff]  }
  0x50   :  { %v3030_v48 = vpack.c.bf16 %v69_v46, %v69_v46  ;;  %v2533_v51 = vld [vmem:[#allocation6 + $0x184] ss:$16 sps:$4 sm:$0xff]   ;;  %v3032_v52 = vpack.c.bf16 %v71_v49, %v71_v49  ;;  %v2537_v54 = vld [vmem:[#allocation6 + $0x180] ss:$16 sps:$4 sm:$0xff]   ;;  %v2614_v49 = vld [vmem:[#allocation6 + $0x128] ss:$16 sps:$4 sm:$0xff]  }
  0x51   :  { %1297 = vmatpush1.bf16.msra.mxu1 %v2501_v26  ;;  %v2535_v53 = vld [vmem:[#allocation6 + $0x384] ss:$16 sps:$4 sm:$0xff]   ;;  %v2538_v55 = vld [vmem:[#allocation6 + $0x380] ss:$16 sps:$4 sm:$0xff]  }
  0x52   :  { %1338 = vmatpush1.bf16.msra.mxu0 %v2502_v27  ;;  %1298 = vmatprep.subr.bf16.mxu1 %v2503_v28  ;;  %v2539_v56 = vld [vmem:[#allocation6 + $0x1a4] ss:$16 sps:$4 sm:$0xff]   ;;  %v2543_v58 = vld [vmem:[#allocation6 + $0x1a0] ss:$16 sps:$4 sm:$0xff]   ;;  %v2584_v27 = vld [vmem:[#allocation6 + $0x88] ss:$16 sps:$4 sm:$0xff]  }
  0x53   :  { %1339 = vmatprep.subr.bf16.mxu0 %v2505_v29  ;;  %1316 = vmatprep.mubr.bf16.mxu1 %v3030_v48  ;;  %v2541_v57 = vld [vmem:[#allocation6 + $0x3a4] ss:$16 sps:$4 sm:$0xff]   ;;  %v2544_v59 = vld [vmem:[#allocation6 + $0x3a0] ss:$16 sps:$4 sm:$0xff]   ;;  %v2592_v29 = vld [vmem:[#allocation6 + $0xac] ss:$16 sps:$4 sm:$0xff]  }
  0x54   :  { %1357 = vmatprep.mubr.bf16.mxu0 %v3032_v52  ;;  %v2545_v60 = vld [vmem:[#allocation6 + $0x1c4] ss:$16 sps:$4 sm:$0xff]   ;;  %v2549_v62 = vld [vmem:[#allocation6 + $0x1c0] ss:$16 sps:$4 sm:$0xff]  }
  0x55   :  { %1299 = vmatpush1.bf16.msra.mxu1 %v2507_v30  ;;  %v2547_v61 = vld [vmem:[#allocation6 + $0x3c4] ss:$16 sps:$4 sm:$0xff]   ;;  %v2550_v63 = vld [vmem:[#allocation6 + $0x3c0] ss:$16 sps:$4 sm:$0xff]  }
  0x56   :  { %1340 = vmatpush1.bf16.msra.mxu0 %v2508_v31  ;;  %1300 = vmatprep.subr.bf16.mxu1 %v2509_v32  ;;  %v2551_v0 = vld [vmem:[#allocation6 + $0x1e4] ss:$16 sps:$4 sm:$0xff]   ;;  %v2555_v2 = vld [vmem:[#allocation6 + $0x1e0] ss:$16 sps:$4 sm:$0xff]   ;;  %v2590_v31 = vld [vmem:[#allocation6 + $0xa8] ss:$16 sps:$4 sm:$0xff]  }
  0x57   :  { %1341 = vmatprep.subr.bf16.mxu0 %v2511_v33  ;;  %v2553_v1 = vld [vmem:[#allocation6 + $0x3e4] ss:$16 sps:$4 sm:$0xff]   ;;  %v2556_v3 = vld [vmem:[#allocation6 + $0x3e0] ss:$16 sps:$4 sm:$0xff]   ;;  %v2598_v33 = vld [vmem:[#allocation6 + $0xcc] ss:$16 sps:$4 sm:$0xff]  }
  0x58   :  { %v2559_v5 = vld [vmem:[#allocation6 + $0x404] ss:$16 sps:$4 sm:$0xff]   ;;  %v2557_v9 = vld [vmem:[#allocation6 + $0x400] ss:$16 sps:$4 sm:$0xff]  }
  0x59   :  { %1301 = vmatpush1.bf16.msra.mxu1 %v2513_v34  ;;  %v2565_v12 = vld [vmem:[#allocation6 + $0x424] ss:$16 sps:$4 sm:$0xff]   ;;  %v2563_v14 = vld [vmem:[#allocation6 + $0x420] ss:$16 sps:$4 sm:$0xff]  }
  0x5a   :  { %1342 = vmatpush1.bf16.msra.mxu0 %v2514_v35  ;;  %1302 = vmatprep.subr.bf16.mxu1 %v2515_v36  ;;  %v2571_v16 = vld [vmem:[#allocation6 + $0x444] ss:$16 sps:$4 sm:$0xff]   ;;  %v2569_v18 = vld [vmem:[#allocation6 + $0x440] ss:$16 sps:$4 sm:$0xff]  }
  0x5b   :  { %1343 = vmatprep.subr.bf16.mxu0 %v2517_v37  ;;  %v2577_v20 = vld [vmem:[#allocation6 + $0x464] ss:$16 sps:$4 sm:$0xff]   ;;  %v2575_v22 = vld [vmem:[#allocation6 + $0x460] ss:$16 sps:$4 sm:$0xff]   ;;  %v2596_v37 = vld [vmem:[#allocation6 + $0xc8] ss:$16 sps:$4 sm:$0xff]  }
  0x5c   :  { %v2583_v24 = vld [vmem:[#allocation6 + $0x484] ss:$16 sps:$4 sm:$0xff]   ;;  %v2581_v26 = vld [vmem:[#allocation6 + $0x480] ss:$16 sps:$4 sm:$0xff]  }
  0x5d   :  { %1303 = vmatpush1.bf16.msra.mxu1 %v2519_v38  ;;  %v2589_v28 = vld [vmem:[#allocation6 + $0x4a4] ss:$16 sps:$4 sm:$0xff]   ;;  %v2587_v30 = vld [vmem:[#allocation6 + $0x4a0] ss:$16 sps:$4 sm:$0xff]  }
  0x5e   :  { %1344 = vmatpush1.bf16.msra.mxu0 %v2520_v39  ;;  %1304 = vmatprep.subr.bf16.mxu1 %v2521_v40  ;;  %v2595_v32 = vld [vmem:[#allocation6 + $0x4c4] ss:$16 sps:$4 sm:$0xff]   ;;  %v2593_v36 = vld [vmem:[#allocation6 + $0x4c0] ss:$16 sps:$4 sm:$0xff]   ;;  %v2604_v39 = vld [vmem:[#allocation6 + $0xec] ss:$16 sps:$4 sm:$0xff]  }
  0x5f   :  { %1345 = vmatprep.subr.bf16.mxu0 %v2523_v41  ;;  %v73_v34 = vld [vmem:[#allocation3 + $0x28] sm:$0xff]  ;;  %v2602_v41 = vld [vmem:[#allocation6 + $0xe8] ss:$16 sps:$4 sm:$0xff]  }
  0x60   :  { %v3043_v35 = vpack.c.bf16 %v73_v34, %v73_v34  ;;  %v2601_v38 = vld [vmem:[#allocation6 + $0x4e4] ss:$16 sps:$4 sm:$0xff]   ;;  %v2599_v40 = vld [vmem:[#allocation6 + $0x4e0] ss:$16 sps:$4 sm:$0xff]  }
  0x61   :  { %1305 = vmatpush1.bf16.msra.mxu1 %v2525_v42  ;;  %v2607_v42 = vld [vmem:[#allocation6 + $0x504] ss:$16 sps:$4 sm:$0xff]  }
  0x62   :  { %1346 = vmatpush1.bf16.msra.mxu0 %v2526_v43  ;;  %1306 = vmatprep.subr.bf16.mxu1 %v2527_v44  ;;  %v2610_v43 = vld [vmem:[#allocation6 + $0x10c] ss:$16 sps:$4 sm:$0xff]   ;;  %v2605_v44 = vld [vmem:[#allocation6 + $0x500] ss:$16 sps:$4 sm:$0xff]   ;;  %v2613_v46 = vld [vmem:[#allocation6 + $0x524] ss:$16 sps:$4 sm:$0xff]  }
  0x63   :  { %1347 = vmatprep.subr.bf16.mxu0 %v2529_v45  ;;  %v2608_v45 = vld [vmem:[#allocation6 + $0x108] ss:$16 sps:$4 sm:$0xff]   ;;  %v2757_v34 = vld [vmem:[#allocation8 + $0x4] ss:$8 sps:$4 sm:$0xff]  }
  0x65   :  { %1307 = vmatpush1.bf16.msra.mxu1 %v2531_v47  ;;  %v2616_v47 = vld [vmem:[#allocation6 + $0x12c] ss:$16 sps:$4 sm:$0xff]  }
  0x66   :  { %1348 = vmatpush1.bf16.msra.mxu0 %v2532_v50  ;;  %1308 = vmatprep.subr.bf16.mxu1 %v2533_v51  ;;  %v2619_v50 = vld [vmem:[#allocation6 + $0x544] ss:$16 sps:$4 sm:$0xff]   ;;  %v2622_v51 = vld [vmem:[#allocation6 + $0x14c] ss:$16 sps:$4 sm:$0xff]  }
  0x67   :  { %1349 = vmatprep.subr.bf16.mxu0 %v2535_v53  ;;  %v2617_v53 = vld [vmem:[#allocation6 + $0x540] ss:$16 sps:$4 sm:$0xff]  }
  0x69   :  { %1309 = vmatpush1.bf16.msra.mxu1 %v2537_v54  ;;  %v2620_v54 = vld [vmem:[#allocation6 + $0x148] ss:$16 sps:$4 sm:$0xff]  }
  0x6a   :  { %1350 = vmatpush1.bf16.msra.mxu0 %v2538_v55  ;;  %1310 = vmatprep.subr.bf16.mxu1 %v2539_v56  ;;  %v2625_v55 = vld [vmem:[#allocation6 + $0x564] ss:$16 sps:$4 sm:$0xff]   ;;  %v2628_v56 = vld [vmem:[#allocation6 + $0x16c] ss:$16 sps:$4 sm:$0xff]  }
  0x6b   :  { %1351 = vmatprep.subr.bf16.mxu0 %v2541_v57  ;;  %v2623_v57 = vld [vmem:[#allocation6 + $0x560] ss:$16 sps:$4 sm:$0xff]  }
  0x6d   :  { %1311 = vmatpush1.bf16.msra.mxu1 %v2543_v58  ;;  %v2626_v58 = vld [vmem:[#allocation6 + $0x168] ss:$16 sps:$4 sm:$0xff]  }
  0x6e   :  { %1352 = vmatpush1.bf16.msra.mxu0 %v2544_v59  ;;  %1312 = vmatprep.subr.bf16.mxu1 %v2545_v60  ;;  %v2631_v59 = vld [vmem:[#allocation6 + $0x584] ss:$16 sps:$4 sm:$0xff]   ;;  %v2634_v60 = vld [vmem:[#allocation6 + $0x18c] ss:$16 sps:$4 sm:$0xff]  }
  0x6f   :  { %1353 = vmatprep.subr.bf16.mxu0 %v2547_v61  ;;  %v2629_v61 = vld [vmem:[#allocation6 + $0x580] ss:$16 sps:$4 sm:$0xff]  }
  0x71   :  { %1313 = vmatpush1.bf16.msra.mxu1 %v2549_v62  ;;  %v2632_v62 = vld [vmem:[#allocation6 + $0x188] ss:$16 sps:$4 sm:$0xff]  }
  0x72   :  { %1354 = vmatpush1.bf16.msra.mxu0 %v2550_v63  ;;  %1314 = vmatprep.subr.bf16.mxu1 %v2551_v0  ;;  %v2637_v63 = vld [vmem:[#allocation6 + $0x5a4] ss:$16 sps:$4 sm:$0xff]   ;;  %v2640_v0 = vld [vmem:[#allocation6 + $0x1ac] ss:$16 sps:$4 sm:$0xff]  }
  0x73   :  { %1355 = vmatprep.subr.bf16.mxu0 %v2553_v1  ;;  %v2635_v1 = vld [vmem:[#allocation6 + $0x5a0] ss:$16 sps:$4 sm:$0xff]  }
  0x75   :  { %1315 = vmatpush1.bf16.msra.mxu1 %v2555_v2  ;;  %v2638_v2 = vld [vmem:[#allocation6 + $0x1a8] ss:$16 sps:$4 sm:$0xff]  }
  0x76   :  { %1356 = vmatpush1.bf16.msra.mxu0 %v2556_v3  ;;  %1448 = vmatprep.subr.bf16.mxu1 %v2562_v7  ;;  %v2643_v3 = vld [vmem:[#allocation6 + $0x5c4] ss:$16 sps:$4 sm:$0xff]  }
  0x77   :  { %1366 = vmatprep.subr.bf16.mxu0 %v2559_v5  ;;  %v2641_v5 = vld [vmem:[#allocation6 + $0x5c0] ss:$16 sps:$4 sm:$0xff]   ;;  %v2649_v7 = vld [vmem:[#allocation6 + $0x5e4] ss:$16 sps:$4 sm:$0xff]  }
  0x78   :  { %1317 = vmatmul.mubr.bf16.vlgmr.msra.gmra.mrb[0].mxu1 %v3036_v8 }
  0x79   :  { %1358 = vmatmul.mubr.bf16.vlgmr.msra.gmra.mrb[0].mxu0 %v3038_v11  ;;  %1449 = vmatpush1.bf16.msra.mxu1 %v2560_v10  ;;  %v2647_v10 = vld [vmem:[#allocation6 + $0x5e0] ss:$16 sps:$4 sm:$0xff]  }
  0x7a   :  { %1367 = vmatpush1.bf16.msra.mxu0 %v2557_v9  ;;  %1450 = vmatprep.subr.bf16.mxu1 %v2568_v13  ;;  %v2652_v9 = vld [vmem:[#allocation6 + $0x1ec] ss:$16 sps:$4 sm:$0xff]  }
  0x7b   :  { %1368 = vmatprep.subr.bf16.mxu0 %v2565_v12  ;;  %1480 = vmatprep.mubr.bf16.mxu1 %v3030_v48  ;;  %v2611_v48 = vld [vmem:[#allocation6 + $0x520] ss:$16 sps:$4 sm:$0xff]   ;;  %v2650_v12 = vld [vmem:[#allocation6 + $0x1e8] ss:$16 sps:$4 sm:$0xff]  }
  0x7c   :  { %1398 = vmatprep.mubr.bf16.mxu0 %v3043_v35  ;;  %v72_v13 = vld [vmem:[#allocation3 + $0x20] sm:$0xff] }
  0x7d   :  { %1451 = vmatpush1.bf16.msra.mxu1 %v2566_v15  ;;  %v2661_v15 = vld [vmem:[#allocation6 + $0x604] ss:$16 sps:$4 sm:$0xff]  }
  0x7e   :  { %1369 = vmatpush1.bf16.msra.mxu0 %v2563_v14  ;;  %1452 = vmatprep.subr.bf16.mxu1 %v2574_v17  ;;  %v2655_v14 = vld [vmem:[#allocation6 + $0x20c] ss:$16 sps:$4 sm:$0xff]   ;;  %v2653_v17 = vld [vmem:[#allocation6 + $0x208] ss:$16 sps:$4 sm:$0xff]  }
  0x7f   :  { %1370 = vmatprep.subr.bf16.mxu0 %v2571_v16  ;;  %v3046_v16 = vpack.c.bf16 %v72_v13, %v72_v13  ;;  %v2709_v13 = vld [vmem:[#allocation6 + $0x42c] ss:$16 sps:$4 sm:$0xff]  }
  0x81   :  { %1453 = vmatpush1.bf16.msra.mxu1 %v2572_v19  ;;  %v2658_v19 = vld [vmem:[#allocation6 + $0x22c] ss:$16 sps:$4 sm:$0xff]  }
  0x82   :  { %1371 = vmatpush1.bf16.msra.mxu0 %v2569_v18  ;;  %1454 = vmatprep.subr.bf16.mxu1 %v2580_v21  ;;  %v2659_v18 = vld [vmem:[#allocation6 + $0x600] ss:$16 sps:$4 sm:$0xff]   ;;  %v2664_v21 = vld [vmem:[#allocation6 + $0x24c] ss:$16 sps:$4 sm:$0xff]  }
  0x83   :  { %1372 = vmatprep.subr.bf16.mxu0 %v2577_v20  ;;  %v2656_v20 = vld [vmem:[#allocation6 + $0x228] ss:$16 sps:$4 sm:$0xff]  }
  0x85   :  { %1455 = vmatpush1.bf16.msra.mxu1 %v2578_v23  ;;  %v2662_v23 = vld [vmem:[#allocation6 + $0x248] ss:$16 sps:$4 sm:$0xff]  }
  0x86   :  { %1373 = vmatpush1.bf16.msra.mxu0 %v2575_v22  ;;  %1456 = vmatprep.subr.bf16.mxu1 %v2586_v25  ;;  %v2952_v22 = vmov 0   ;;  %v2667_v25 = vld [vmem:[#allocation6 + $0x26c] ss:$16 sps:$4 sm:$0xff]  }
  0x87   :  { %1374 = vmatprep.subr.bf16.mxu0 %v2583_v24  ;;  %v74_v24 = vld [vmem:[#allocation3 + $0x30] sm:$0xff] }
  0x89   :  { %1457 = vmatpush1.bf16.msra.mxu1 %v2584_v27  ;;  %v3052_v27 = vpack.c.bf16 %v74_v24, %v74_v24  ;;  %v2791_v24 = vld [vmem:[#allocation8 + $0xc0] ss:$8 sps:$4 sm:$0xff]  }
  0x8a   :  { %1375 = vmatpush1.bf16.msra.mxu0 %v2581_v26  ;;  %1458 = vmatprep.subr.bf16.mxu1 %v2592_v29  ;;  %v2665_v26 = vld [vmem:[#allocation6 + $0x268] ss:$16 sps:$4 sm:$0xff]   ;;  %v2673_v29 = vld [vmem:[#allocation6 + $0x2ac] ss:$16 sps:$4 sm:$0xff]  }
  0x8b   :  { %1376 = vmatprep.subr.bf16.mxu0 %v2589_v28  ;;  %v2670_v28 = vld [vmem:[#allocation6 + $0x28c] ss:$16 sps:$4 sm:$0xff]  }
  0x8d   :  { %1459 = vmatpush1.bf16.msra.mxu1 %v2590_v31  ;;  %v2676_v31 = vld [vmem:[#allocation6 + $0x2cc] ss:$16 sps:$4 sm:$0xff]  }
  0x8e   :  { %1377 = vmatpush1.bf16.msra.mxu0 %v2587_v30  ;;  %1460 = vmatprep.subr.bf16.mxu1 %v2598_v33  ;;  %v2671_v30 = vld [vmem:[#allocation6 + $0x2a8] ss:$16 sps:$4 sm:$0xff]  }
  0x8f   :  { %1378 = vmatprep.subr.bf16.mxu0 %v2595_v32  ;;  %v2679_v32 = vld [vmem:[#allocation6 + $0x2ec] ss:$16 sps:$4 sm:$0xff]   ;;  %v2755_v33 = vld [vmem:[#allocation8] ss:$8 sps:$4 sm:$0xff]  }
  0x91   :  { %1461 = vmatpush1.bf16.msra.mxu1 %v2596_v37  ;;  %v2677_v37 = vld [vmem:[#allocation6 + $0x2e8] ss:$16 sps:$4 sm:$0xff]  }
  0x92   :  { %1379 = vmatpush1.bf16.msra.mxu0 %v2593_v36  ;;  %1462 = vmatprep.subr.bf16.mxu1 %v2604_v39  ;;  %v2760_v36 = vld [vmem:[#allocation8 + $0x14] ss:$8 sps:$4 sm:$0xff]  }
  0x93   :  { %1380 = vmatprep.subr.bf16.mxu0 %v2601_v38  ;;  %v2758_v38 = vld [vmem:[#allocation8 + $0x10] ss:$8 sps:$4 sm:$0xff]   ;;  %v2682_v39 = vld [vmem:[#allocation6 + $0x30c] ss:$16 sps:$4 sm:$0xff]  }
  0x95   :  { %1463 = vmatpush1.bf16.msra.mxu1 %v2602_v41  ;;  %v2680_v41 = vld [vmem:[#allocation6 + $0x308] ss:$16 sps:$4 sm:$0xff]  }
  0x96   :  { %1381 = vmatpush1.bf16.msra.mxu0 %v2599_v40  ;;  %1464 = vmatprep.subr.bf16.mxu1 %v2610_v43  ;;  %v2763_v40 = vld [vmem:[#allocation8 + $0x24] ss:$8 sps:$4 sm:$0xff]  }
  0x97   :  { %1382 = vmatprep.subr.bf16.mxu0 %v2607_v42  ;;  %v2761_v42 = vld [vmem:[#allocation8 + $0x20] ss:$8 sps:$4 sm:$0xff]   ;;  %v2685_v43 = vld [vmem:[#allocation6 + $0x32c] ss:$16 sps:$4 sm:$0xff]  }
  0x99   :  { %1465 = vmatpush1.bf16.msra.mxu1 %v2608_v45  ;;  %v2683_v45 = vld [vmem:[#allocation6 + $0x328] ss:$16 sps:$4 sm:$0xff]  }
  0x9a   :  { %1383 = vmatpush1.bf16.msra.mxu0 %v2605_v44  ;;  %1466 = vmatprep.subr.bf16.mxu1 %v2616_v47  ;;  %v2766_v44 = vld [vmem:[#allocation8 + $0x34] ss:$8 sps:$4 sm:$0xff]  }
  0x9b   :  { %1384 = vmatprep.subr.bf16.mxu0 %v2613_v46  ;;  %v2764_v46 = vld [vmem:[#allocation8 + $0x30] ss:$8 sps:$4 sm:$0xff]   ;;  %v2688_v47 = vld [vmem:[#allocation6 + $0x34c] ss:$16 sps:$4 sm:$0xff]  }
  0x9d   :  { %1467 = vmatpush1.bf16.msra.mxu1 %v2614_v49  ;;  %v2686_v49 = vld [vmem:[#allocation6 + $0x348] ss:$16 sps:$4 sm:$0xff]  }
  0x9e   :  { %1385 = vmatpush1.bf16.msra.mxu0 %v2611_v48  ;;  %1468 = vmatprep.subr.bf16.mxu1 %v2622_v51  ;;  %v2769_v48 = vld [vmem:[#allocation8 + $0x44] ss:$8 sps:$4 sm:$0xff]  }
  0x9f   :  { %1386 = vmatprep.subr.bf16.mxu0 %v2619_v50  ;;  %v2767_v50 = vld [vmem:[#allocation8 + $0x40] ss:$8 sps:$4 sm:$0xff]   ;;  %v2691_v51 = vld [vmem:[#allocation6 + $0x36c] ss:$16 sps:$4 sm:$0xff]  }
  0xa1   :  { %1469 = vmatpush1.bf16.msra.mxu1 %v2620_v54  ;;  %v2689_v54 = vld [vmem:[#allocation6 + $0x368] ss:$16 sps:$4 sm:$0xff]  }
  0xa2   :  { %1387 = vmatpush1.bf16.msra.mxu0 %v2617_v53  ;;  %1470 = vmatprep.subr.bf16.mxu1 %v2628_v56  ;;  %v2772_v53 = vld [vmem:[#allocation8 + $0x54] ss:$8 sps:$4 sm:$0xff]  }
  0xa3   :  { %1388 = vmatprep.subr.bf16.mxu0 %v2625_v55  ;;  %v2770_v55 = vld [vmem:[#allocation8 + $0x50] ss:$8 sps:$4 sm:$0xff]   ;;  %v2694_v56 = vld [vmem:[#allocation6 + $0x38c] ss:$16 sps:$4 sm:$0xff]  }
  0xa5   :  { %1471 = vmatpush1.bf16.msra.mxu1 %v2626_v58  ;;  %v2692_v58 = vld [vmem:[#allocation6 + $0x388] ss:$16 sps:$4 sm:$0xff]  }
  0xa6   :  { %1389 = vmatpush1.bf16.msra.mxu0 %v2623_v57  ;;  %1472 = vmatprep.subr.bf16.mxu1 %v2634_v60  ;;  %v2775_v57 = vld [vmem:[#allocation8 + $0x64] ss:$8 sps:$4 sm:$0xff]  }
  0xa7   :  { %1390 = vmatprep.subr.bf16.mxu0 %v2631_v59  ;;  %v2773_v59 = vld [vmem:[#allocation8 + $0x60] ss:$8 sps:$4 sm:$0xff]   ;;  %v2697_v60 = vld [vmem:[#allocation6 + $0x3ac] ss:$16 sps:$4 sm:$0xff]  }
  0xa9   :  { %1473 = vmatpush1.bf16.msra.mxu1 %v2632_v62  ;;  %v2695_v62 = vld [vmem:[#allocation6 + $0x3a8] ss:$16 sps:$4 sm:$0xff]  }
  0xaa   :  { %1391 = vmatpush1.bf16.msra.mxu0 %v2629_v61  ;;  %1474 = vmatprep.subr.bf16.mxu1 %v2640_v0  ;;  %v2778_v61 = vld [vmem:[#allocation8 + $0x74] ss:$8 sps:$4 sm:$0xff]  }
  0xab   :  { %1392 = vmatprep.subr.bf16.mxu0 %v2637_v63  ;;  %v2776_v63 = vld [vmem:[#allocation8 + $0x70] ss:$8 sps:$4 sm:$0xff]   ;;  %v2700_v0 = vld [vmem:[#allocation6 + $0x3cc] ss:$16 sps:$4 sm:$0xff]  }
  0xad   :  { %1475 = vmatpush1.bf16.msra.mxu1 %v2638_v2  ;;  %v2698_v2 = vld [vmem:[#allocation6 + $0x3c8] ss:$16 sps:$4 sm:$0xff]  }
  0xae   :  { %1393 = vmatpush1.bf16.msra.mxu0 %v2635_v1  ;;  %1476 = vmatprep.subr.bf16.mxu1 %v2646_v4  ;;  %v2781_v1 = vld [vmem:[#allocation8 + $0x84] ss:$8 sps:$4 sm:$0xff]  }
  0xaf   :  { %1394 = vmatprep.subr.bf16.mxu0 %v2643_v3  ;;  %v2779_v3 = vld [vmem:[#allocation8 + $0x80] ss:$8 sps:$4 sm:$0xff]   ;;  %v2703_v4 = vld [vmem:[#allocation6 + $0x3ec] ss:$16 sps:$4 sm:$0xff]  }
  0xb1   :  { %1477 = vmatpush1.bf16.msra.mxu1 %v2644_v6  ;;  %v2701_v6 = vld [vmem:[#allocation6 + $0x3e8] ss:$16 sps:$4 sm:$0xff]  }
  0xb2   :  { %1395 = vmatpush1.bf16.msra.mxu0 %v2641_v5  ;;  %1478 = vmatprep.subr.bf16.mxu1 %v2652_v9  ;;  %v2784_v5 = vld [vmem:[#allocation8 + $0x94] ss:$8 sps:$4 sm:$0xff]  }
  0xb3   :  { %1396 = vmatprep.subr.bf16.mxu0 %v2649_v7  ;;  %v2782_v7 = vld [vmem:[#allocation8 + $0x90] ss:$8 sps:$4 sm:$0xff]   ;;  %v2706_v9 = vld [vmem:[#allocation6 + $0x40c] ss:$16 sps:$4 sm:$0xff]  }
  0xb5   :  { %1479 = vmatpush1.bf16.msra.mxu1 %v2650_v12  ;;  %v2704_v12 = vld [vmem:[#allocation6 + $0x408] ss:$16 sps:$4 sm:$0xff]  }
  0xb6   :  { %1397 = vmatpush1.bf16.msra.mxu0 %v2647_v10  ;;  %1489 = vmatprep.subr.bf16.mxu1 %v2655_v14  ;;  %v2787_v10 = vld [vmem:[#allocation8 + $0xa4] ss:$8 sps:$4 sm:$0xff]   ;;  %v2785_v14 = vld [vmem:[#allocation8 + $0xa0] ss:$8 sps:$4 sm:$0xff]  }
  0xb7   :  { %1407 = vmatprep.subr.bf16.mxu0 %v2661_v15  ;;  %v2790_v15 = vld [vmem:[#allocation8 + $0xb4] ss:$8 sps:$4 sm:$0xff]  }
  0xb8   :  { %1481 = vmatmul.mubr.bf16.vlgmr.msra.gmra.mrb[4].mxu1 %v3036_v8  ;;  %v2668_v8 = vld [vmem:[#allocation6 + $0x288] ss:$16 sps:$4 sm:$0xff]  }
  0xb9   :  { %1399 = vmatmul.mubr.bf16.vlgmr.msra.gmra.mrb[0].mxu0 %v3046_v16  ;;  %1490 = vmatpush1.bf16.msra.mxu1 %v2653_v17  ;;  %v2707_v17 = vld [vmem:[#allocation6 + $0x428] ss:$16 sps:$4 sm:$0xff]  }
  0xba   :  { %1408 = vmatpush1.bf16.msra.mxu0 %v2659_v18  ;;  %1491 = vmatprep.subr.bf16.mxu1 %v2658_v19  ;;  %v2712_v18 = vld [vmem:[#allocation6 + $0x44c] ss:$16 sps:$4 sm:$0xff]   ;;  %v2788_v19 = vld [vmem:[#allocation8 + $0xb0] ss:$8 sps:$4 sm:$0xff]  }
  0xbb   :  { %1439 = vmatprep.mubr.bf16.mxu0 %v2952_v22  ;;  %1521 = vmatprep.mubr.bf16.mxu1 %v3032_v52  ;;  %v2674_v52 = vld [vmem:[#allocation6 + $0x2c8] ss:$16 sps:$4 sm:$0xff]  }
  0xbc   :  { %2024 = vmatprep.subr.bf16.mxu0 %v2757_v34  ;;  %v2728_v34 = vld [vmem:[#allocation6 + $0x508] ss:$16 sps:$4 sm:$0xff]  }
  0xbd   :  { %1492 = vmatpush1.bf16.msra.mxu1 %v2656_v20  ;;  %v2793_v20 = vld [vmem:[#allocation8 + $0xc4] ss:$8 sps:$4 sm:$0xff]  }
  0xbe   :  { %1493 = vmatprep.subr.bf16.mxu1 %v2664_v21  ;;  %v2710_v21 = vld [vmem:[#allocation6 + $0x448] ss:$16 sps:$4 sm:$0xff]  }
  0xc1   :  { %1494 = vmatpush1.bf16.msra.mxu1 %v2662_v23  ;;  %v2715_v23 = vld [vmem:[#allocation6 + $0x46c] ss:$16 sps:$4 sm:$0xff]  }
  0xc2   :  { %1495 = vmatprep.subr.bf16.mxu1 %v2667_v25  ;;  %v2796_v25 = vld [vmem:[#allocation8 + $0xd4] ss:$8 sps:$4 sm:$0xff]  }
  0xc5   :  { %2354 = vmatmul.mubr.msk.bf16.vlgmr.msra.gmra.mrb[0].mxu0 %vm1280_vm0, %v3052_v27  ;;  %1496 = vmatpush1.bf16.msra.mxu1 %v2665_v26  ;;  %v2718_v26 = vld [vmem:[#allocation6 + $0x48c] ss:$16 sps:$4 sm:$0xff]  }
  0xc6   :  { %1497 = vmatprep.subr.bf16.mxu1 %v2670_v28  ;;  %2025 = vmatpush1.bf16.msra.mxu0 %v2755_v33  ;;  %v2716_v28 = vld [vmem:[#allocation6 + $0x488] ss:$16 sps:$4 sm:$0xff]   ;;  %v2730_v33 = vld [vmem:[#allocation6 + $0x50c] ss:$16 sps:$4 sm:$0xff]  }
  0xc7   :  { %2026 = vmatprep.subr.bf16.mxu0 %v2760_v36  ;;  %v2733_v36 = vld [vmem:[#allocation6 + $0x52c] ss:$16 sps:$4 sm:$0xff]  }
  0xc9   :  { %1498 = vmatpush1.bf16.msra.mxu1 %v2668_v8  ;;  %v2721_v8 = vld [vmem:[#allocation6 + $0x4ac] ss:$16 sps:$4 sm:$0xff]  }
  0xca   :  { %1499 = vmatprep.subr.bf16.mxu1 %v2673_v29  ;;  %2027 = vmatpush1.bf16.msra.mxu0 %v2758_v38  ;;  %v2719_v29 = vld [vmem:[#allocation6 + $0x4a8] ss:$16 sps:$4 sm:$0xff]  }
  0xcb   :  { %2028 = vmatprep.subr.bf16.mxu0 %v2763_v40  ;;  %v2797_v38 = vld [vmem:[#allocation8 + $0xe0] ss:$8 sps:$4 sm:$0xff]   ;;  %v2736_v40 = vld [vmem:[#allocation6 + $0x54c] ss:$16 sps:$4 sm:$0xff]  }
  0xcd   :  { %1500 = vmatpush1.bf16.msra.mxu1 %v2671_v30  ;;  %v2724_v30 = vld [vmem:[#allocation6 + $0x4cc] ss:$16 sps:$4 sm:$0xff]  }
  0xce   :  { %1501 = vmatprep.subr.bf16.mxu1 %v2676_v31  ;;  %2029 = vmatpush1.bf16.msra.mxu0 %v2761_v42  ;;  %v2722_v31 = vld [vmem:[#allocation6 + $0x4c8] ss:$16 sps:$4 sm:$0xff]  }
  0xcf   :  { %2030 = vmatprep.subr.bf16.mxu0 %v2766_v44  ;;  %v2800_v42 = vld [vmem:[#allocation8 + $0xf0] ss:$8 sps:$4 sm:$0xff]   ;;  %v2739_v44 = vld [vmem:[#allocation6 + $0x56c] ss:$16 sps:$4 sm:$0xff]  }
  0xd1   :  { %1502 = vmatpush1.bf16.msra.mxu1 %v2674_v52  ;;  %v2727_v52 = vld [vmem:[#allocation6 + $0x4ec] ss:$16 sps:$4 sm:$0xff]  }
  0xd2   :  { %1503 = vmatprep.subr.bf16.mxu1 %v2679_v32  ;;  %2031 = vmatpush1.bf16.msra.mxu0 %v2764_v46  ;;  %v2725_v32 = vld [vmem:[#allocation6 + $0x4e8] ss:$16 sps:$4 sm:$0xff]   ;;  %v2805_v46 = vld [vmem:[#allocation8 + $0x104] ss:$8 sps:$4 sm:$0xff]  }
  0xd3   :  { %2032 = vmatprep.subr.bf16.mxu0 %v2769_v48  ;;  %v2740_v48 = vld [vmem:[#allocation6 + $0x588] ss:$16 sps:$4 sm:$0xff]  }
  0xd5   :  { %1504 = vmatpush1.bf16.msra.mxu1 %v2677_v37  ;;  %v2799_v37 = vld [vmem:[#allocation8 + $0xe4] ss:$8 sps:$4 sm:$0xff]  }
  0xd6   :  { %1505 = vmatprep.subr.bf16.mxu1 %v2682_v39  ;;  %2033 = vmatpush1.bf16.msra.mxu0 %v2767_v50  ;;  %v2731_v39 = vld [vmem:[#allocation6 + $0x528] ss:$16 sps:$4 sm:$0xff]  }
  0xd7   :  { %2034 = vmatprep.subr.bf16.mxu0 %v2772_v53  ;;  %v2743_v50 = vld [vmem:[#allocation6 + $0x5a8] ss:$16 sps:$4 sm:$0xff]  }
  0xd8   :  { %v2746_v53 = vld [vmem:[#allocation6 + $0x5c8] ss:$16 sps:$4 sm:$0xff]  }
  0xd9   :  { %1506 = vmatpush1.bf16.msra.mxu1 %v2680_v41  ;;  %v2802_v41 = vld [vmem:[#allocation8 + $0xf4] ss:$8 sps:$4 sm:$0xff]  }
  0xda   :  { %1507 = vmatprep.subr.bf16.mxu1 %v2685_v43  ;;  %2035 = vmatpush1.bf16.msra.mxu0 %v2770_v55  ;;  %v2734_v43 = vld [vmem:[#allocation6 + $0x548] ss:$16 sps:$4 sm:$0xff]  }
  0xdb   :  { %2036 = vmatprep.subr.bf16.mxu0 %v2775_v57  ;;  %v2749_v55 = vld [vmem:[#allocation6 + $0x5e8] ss:$16 sps:$4 sm:$0xff]  }
  0xdc   :  { %v2752_v57 = vld [vmem:[#allocation6 + $0x608] ss:$16 sps:$4 sm:$0xff]  }
  0xdd   :  { %1508 = vmatpush1.bf16.msra.mxu1 %v2683_v45  ;;  %v2737_v45 = vld [vmem:[#allocation6 + $0x568] ss:$16 sps:$4 sm:$0xff]  }
  0xde   :  { %1509 = vmatprep.subr.bf16.mxu1 %v2688_v47  ;;  %2037 = vmatpush1.bf16.msra.mxu0 %v2773_v59  ;;  %v2742_v47 = vld [vmem:[#allocation6 + $0x58c] ss:$16 sps:$4 sm:$0xff]  }
  0xdf   :  { %2038 = vmatprep.subr.bf16.mxu0 %v2778_v61 }
  0xe1   :  { %1510 = vmatpush1.bf16.msra.mxu1 %v2686_v49  ;;  %v2745_v49 = vld [vmem:[#allocation6 + $0x5ac] ss:$16 sps:$4 sm:$0xff]  }
  0xe2   :  { %1511 = vmatprep.subr.bf16.mxu1 %v2691_v51  ;;  %2039 = vmatpush1.bf16.msra.mxu0 %v2776_v63  ;;  %v2748_v51 = vld [vmem:[#allocation6 + $0x5cc] ss:$16 sps:$4 sm:$0xff]  }
  0xe3   :  { %2040 = vmatprep.subr.bf16.mxu0 %v2781_v1 }
  0xe5   :  { %1512 = vmatpush1.bf16.msra.mxu1 %v2689_v54  ;;  %v2751_v54 = vld [vmem:[#allocation6 + $0x5ec] ss:$16 sps:$4 sm:$0xff]  }
  0xe6   :  { %1513 = vmatprep.subr.bf16.mxu1 %v2694_v56  ;;  %2041 = vmatpush1.bf16.msra.mxu0 %v2779_v3  ;;  %v2754_v56 = vld [vmem:[#allocation6 + $0x60c] ss:$16 sps:$4 sm:$0xff]  }
  0xe7   :  { %2042 = vmatprep.subr.bf16.mxu0 %v2784_v5 }
  0xe9   :  { %1514 = vmatpush1.bf16.msra.mxu1 %v2692_v58 }
  0xea   :  { %1515 = vmatprep.subr.bf16.mxu1 %v2697_v60  ;;  %2043 = vmatpush1.bf16.msra.mxu0 %v2782_v7 }
  0xeb   :  { %2044 = vmatprep.subr.bf16.mxu0 %v2787_v10 }
  0xed   :  { %1516 = vmatpush1.bf16.msra.mxu1 %v2695_v62  ;;  %v280_v62 = vlaneseq }
  0xee   :  { %1517 = vmatprep.subr.bf16.mxu1 %v2700_v0  ;;  %2045 = vmatpush1.bf16.msra.mxu0 %v2785_v14 }
  0xef   :  { %2046 = vmatprep.subr.bf16.mxu0 %v2790_v15  ;;  %v3063_v63 = vshrl.u32 %v280_v62, 7 }
  0xf1   :  { %1518 = vmatpush1.bf16.msra.mxu1 %v2698_v2  ;;  %v3066_v0 = vsub.s32 0, %v3063_v63 }
  0xf2   :  { %1519 = vmatprep.subr.bf16.mxu1 %v2703_v4  ;;  %2047 = vmatpush1.bf16.msra.mxu0 %v2788_v19 }
  0xf3   :  { %2048 = vmatprep.subr.bf16.mxu0 %v2793_v20  ;;  %v2808_v20 = vld [vmem:[#allocation8 + $0x114] ss:$8 sps:$4 sm:$0xff]  }
  0xf5   :  { %1520 = vmatpush1.bf16.msra.mxu1 %v2701_v6 }
  0xf6   :  { %1530 = vmatprep.subr.bf16.mxu1 %v2706_v9  ;;  %2049 = vmatpush1.bf16.msra.mxu0 %v2791_v24  ;;  %v2809_v24 = vld [vmem:[#allocation8 + $0x120] ss:$8 sps:$4 sm:$0xff]  }
  0xf7   :  { %2050 = vmatprep.subr.bf16.mxu0 %v2796_v25  ;;  %v2814_v25 = vld [vmem:[#allocation8 + $0x134] ss:$8 sps:$4 sm:$0xff]  }
  0xf8   :  { %1522 = vmatmul.mubr.bf16.vlgmr.msra.gmra.mrb[4].mxu1 %v3038_v11  ;;  %v2713_v11 = vld [vmem:[#allocation6 + $0x468] ss:$16 sps:$4 sm:$0xff]  }
  0xf9   :  { %1531 = vmatpush1.bf16.msra.mxu1 %v2704_v12  ;;  %1562 = vmatprep.mubr.bf16.mxu1 %v3043_v35  ;;  %v2794_v35 = vld [vmem:[#allocation8 + $0xd0] ss:$8 sps:$4 sm:$0xff]  }
  0xfa   :  { %1532 = vmatprep.subr.bf16.mxu1 %v2709_v13  ;;  %2051 = vmatpush1.bf16.msra.mxu0 %v2794_v35  ;;  %v2815_v35 = vld [vmem:[#allocation8 + $0x140] ss:$8 sps:$4 sm:$0xff]  }
  0xfb   :  { %2052 = vmatprep.subr.bf16.mxu0 %v2799_v37  ;;  %v2835_v37 = vld [vmem:[#allocation8 + $0x1a4] ss:$8 sps:$4 sm:$0xff]  }
  0xfd   :  { %1533 = vmatpush1.bf16.msra.mxu1 %v2707_v17 }
  0xfe   :  { %1534 = vmatprep.subr.bf16.mxu1 %v2712_v18  ;;  %2053 = vmatpush1.bf16.msra.mxu0 %v2797_v38  ;;  %v2803_v18 = vld [vmem:[#allocation8 + $0x100] ss:$8 sps:$4 sm:$0xff]  }
  0xff   :  { %2054 = vmatprep.subr.bf16.mxu0 %v2802_v41  ;;  %v2833_v38 = vld [vmem:[#allocation8 + $0x1a0] ss:$8 sps:$4 sm:$0xff]   ;;  %v2841_v41 = vld [vmem:[#allocation8 + $0x1c4] ss:$8 sps:$4 sm:$0xff]  }
 0x101   :  { %1535 = vmatpush1.bf16.msra.mxu1 %v2710_v21  ;;  %v2806_v21 = vld [vmem:[#allocation8 + $0x110] ss:$8 sps:$4 sm:$0xff]  }
 0x102   :  { %1536 = vmatprep.subr.bf16.mxu1 %v2715_v23  ;;  %2055 = vmatpush1.bf16.msra.mxu0 %v2800_v42  ;;  %v2811_v23 = vld [vmem:[#allocation8 + $0x124] ss:$8 sps:$4 sm:$0xff]   ;;  %v2839_v42 = vld [vmem:[#allocation8 + $0x1c0] ss:$8 sps:$4 sm:$0xff]  }
 0x103   :  { %2065 = vmatprep.subr.bf16.mxu0 %v2805_v46  ;;  %v2845_v46 = vld [vmem:[#allocation8 + $0x1e0] ss:$8 sps:$4 sm:$0xff]  }
 0x105   :  { %1537 = vmatpush1.bf16.msra.mxu1 %v2713_v11  ;;  %v2812_v11 = vld [vmem:[#allocation8 + $0x130] ss:$8 sps:$4 sm:$0xff]  }
 0x106   :  { %1538 = vmatprep.subr.bf16.mxu1 %v2718_v26  ;;  %v2817_v26 = vld [vmem:[#allocation8 + $0x144] ss:$8 sps:$4 sm:$0xff]  }
 0x109   :  { %1539 = vmatpush1.bf16.msra.mxu1 %v2716_v28  ;;  %v2820_v28 = vld [vmem:[#allocation8 + $0x154] ss:$8 sps:$4 sm:$0xff]  }
 0x10a   :  { %1540 = vmatprep.subr.bf16.mxu1 %v2721_v8  ;;  %v2818_v8 = vld [vmem:[#allocation8 + $0x150] ss:$8 sps:$4 sm:$0xff]  }
 0x10d   :  { %1541 = vmatpush1.bf16.msra.mxu1 %v2719_v29  ;;  %v2823_v29 = vld [vmem:[#allocation8 + $0x164] ss:$8 sps:$4 sm:$0xff]  }
 0x10e   :  { %1542 = vmatprep.subr.bf16.mxu1 %v2724_v30  ;;  %v2821_v30 = vld [vmem:[#allocation8 + $0x160] ss:$8 sps:$4 sm:$0xff]  }
 0x111   :  { %1543 = vmatpush1.bf16.msra.mxu1 %v2722_v31  ;;  %v2826_v31 = vld [vmem:[#allocation8 + $0x174] ss:$8 sps:$4 sm:$0xff]  }
 0x112   :  { %1544 = vmatprep.subr.bf16.mxu1 %v2727_v52  ;;  %v2824_v52 = vld [vmem:[#allocation8 + $0x170] ss:$8 sps:$4 sm:$0xff]  }
 0x115   :  { %1545 = vmatpush1.bf16.msra.mxu1 %v2725_v32  ;;  %v2829_v32 = vld [vmem:[#allocation8 + $0x184] ss:$8 sps:$4 sm:$0xff]  }
 0x116   :  { %1546 = vmatprep.subr.bf16.mxu1 %v2730_v33  ;;  %v2827_v33 = vld [vmem:[#allocation8 + $0x180] ss:$8 sps:$4 sm:$0xff]  }
 0x119   :  { %1547 = vmatpush1.bf16.msra.mxu1 %v2728_v34  ;;  %v2832_v34 = vld [vmem:[#allocation8 + $0x194] ss:$8 sps:$4 sm:$0xff]  }
 0x11a   :  { %1548 = vmatprep.subr.bf16.mxu1 %v2733_v36  ;;  %v2830_v36 = vld [vmem:[#allocation8 + $0x190] ss:$8 sps:$4 sm:$0xff]  }
 0x11d   :  { %1549 = vmatpush1.bf16.msra.mxu1 %v2731_v39  ;;  %v2838_v39 = vld [vmem:[#allocation8 + $0x1b4] ss:$8 sps:$4 sm:$0xff]  }
 0x11e   :  { %1550 = vmatprep.subr.bf16.mxu1 %v2736_v40  ;;  %v2836_v40 = vld [vmem:[#allocation8 + $0x1b0] ss:$8 sps:$4 sm:$0xff]  }
 0x121   :  { %1551 = vmatpush1.bf16.msra.mxu1 %v2734_v43  ;;  %v2844_v43 = vld [vmem:[#allocation8 + $0x1d4] ss:$8 sps:$4 sm:$0xff]  }
 0x122   :  { %1552 = vmatprep.subr.bf16.mxu1 %v2739_v44  ;;  %v2842_v44 = vld [vmem:[#allocation8 + $0x1d0] ss:$8 sps:$4 sm:$0xff]  }
 0x125   :  { %1553 = vmatpush1.bf16.msra.mxu1 %v2737_v45  ;;  %v2847_v45 = vld [vmem:[#allocation8 + $0x1e4] ss:$8 sps:$4 sm:$0xff]  }
 0x126   :  { %1554 = vmatprep.subr.bf16.mxu1 %v2742_v47  ;;  %v2850_v47 = vld [vmem:[#allocation8 + $0x1f4] ss:$8 sps:$4 sm:$0xff]  }
 0x129   :  { %1555 = vmatpush1.bf16.msra.mxu1 %v2740_v48  ;;  %v2848_v48 = vld [vmem:[#allocation8 + $0x1f0] ss:$8 sps:$4 sm:$0xff]  }
 0x12a   :  { %1556 = vmatprep.subr.bf16.mxu1 %v2745_v49  ;;  %v290_v49 = vsub.s32 2, %v3063_v63 }
 0x12d   :  { %1557 = vmatpush1.bf16.msra.mxu1 %v2743_v50  ;;  %v294_v50 = vsub.s32 3, %v3063_v63 }
 0x12e   :  { %1558 = vmatprep.subr.bf16.mxu1 %v2748_v51 }
 0x131   :  { %1559 = vmatpush1.bf16.msra.mxu1 %v2746_v53 }
 0x132   :  { %1560 = vmatprep.subr.bf16.mxu1 %v2751_v54 }
 0x135   :  { %1561 = vmatpush1.bf16.msra.mxu1 %v2749_v55 }
 0x136   :  { %1571 = vmatprep.subr.bf16.mxu1 %v2754_v56 }
 0x138   :  { %1563 = vmatmul.mubr.bf16.vlgmr.msra.gmra.mrb[4].mxu1 %v3046_v16  ;;  %v3071_v16 = vld [vmem:[%s3113_s2] sm:$0xf] }
 0x139   :  { %1572 = vmatpush1.bf16.msra.mxu1 %v2752_v57  ;;  %1603 = vmatprep.mubr.bf16.mxu1 %v2952_v22  ;;  %v3074_v22 = vsub.s32 1, %v3063_v63  ;;  %v291_v51 = vrot.slane %v3071_v16, %v290_v49  ;;  %v295_v53 = vrot.slane %v3071_v16, %v294_v50 }
 0x13b   :  { %v287_v1 = vrot.slane %v3071_v16, %v3074_v22 }
 0x144   :  { %2355 = vmatmul.mubr.msk.bf16.vlgmr.msra.gmra.mrb[4].mxu1 %vm1280_vm0, %v3052_v27  ;;  %v283_v27 = vrot.slane %v3071_v16, %v3066_v0  ;;  %v1692_v16 = vld [vmem:[%s3115_s4] sm:$0x3] }
 0x14b   :  { %v1318_v58 = vpop.f32.mrb[0].mxu1 }
 0x14c   :  { %v1320_v59 = vpop.f32.mrb[1].mxu1  ;;  %v1319_v2 = vadd.f32 %v1318_v58, %v283_v27 }
 0x14d   :  { %v1322_v60 = vpop.f32.mrb[2].mxu1  ;;  %v1321_v3 = vadd.f32 %v1320_v59, %v287_v1 }
 0x14e   :  { %v1323_v61 = vpop.f32.mrb[3].mxu1 }
 0x198   :  { %v1441_v4 = vpop.f32.mrb[0].mxu0 }
 0x199   :  { %v2421_v5 = vadd.f32 %v1441_v4, %v1319_v2  ;;  %v1443_v6 = vpop.f32.mrb[1].mxu0  ;;  %v1697_v4 = vrot.slane %v1692_v16, %v3066_v0 }
 0x19a   :  { %v2423_v7 = vadd.f32 %v1443_v6, %v1321_v3  ;;  %v1445_v9 = vpop.f32.mrb[2].mxu0  ;;  %v2112_v6 = vld [vmem:[%s3116_s5] sm:$0x3] }
 0x19b   :  { %vm1612_vm1 = vcmp.gt.f32.partialorder %v2421_v5, 0.0  ;;  %v1616_v10 = vmul.f32 0.2, %v2421_v5  ;;  %v1446_v12 = vpop.f32.mrb[3].mxu0 }
 0x19c   :  { %vm1613_vm2 = vcmp.gt.f32.partialorder %v2423_v7, 0.0  ;;  %v1617_v13 = vmul.f32 0.2, %v2423_v7 }
 0x19d   :  { %v1620_v14 = vsel %vm1612_vm1, %v2421_v5, %v1616_v10  ;;  %v1701_v5 = vrot.slane %v1692_v16, %v3074_v22 }
 0x19e   :  { %v1621_v15 = vsel %vm1613_vm2, %v2423_v7, %v1617_v13  ;;  %v1624_v19 = vpack.c.bf16 %v1620_v14, %v1620_v14  ;;  %v2117_v14 = vrot.slane %v2112_v6, %v3066_v0 }
 0x19f   :  { %v1625_v17 = vpack.c.bf16 %v1621_v15, %v1621_v15 }
 0x1a1   :  { %2056 = vmatprep.mubr.bf16.mxu0 %v1625_v17 }
 0x1a2   :  { %2057 = vmatmul.mubr.bf16.vlgmr.msra.gmra.mrb[4].mxu0 %v1624_v19 }
 0x1a3   :  { %2066 = vmatpush1.bf16.msra.mxu0 %v2803_v18  ;;  %v2121_v18 = vrot.slane %v2112_v6, %v3074_v22 }
 0x1a4   :  { %2067 = vmatprep.subr.bf16.mxu0 %v2808_v20 }
 0x1a7   :  { %2068 = vmatpush1.bf16.msra.mxu0 %v2806_v21 }
 0x1a8   :  { %2069 = vmatprep.subr.bf16.mxu0 %v2811_v23 }
 0x1ab   :  { %2070 = vmatpush1.bf16.msra.mxu0 %v2809_v24 }
 0x1ac   :  { %2071 = vmatprep.subr.bf16.mxu0 %v2814_v25 }
 0x1af   :  { %2072 = vmatpush1.bf16.msra.mxu0 %v2812_v11  ;;  %v2134_v11 = vand.u32 127, %v280_v62 }
 0x1b0   :  { %2073 = vmatprep.subr.bf16.mxu0 %v2817_v26  ;;  %v2130_v26 = vstv %s3117_s6 }
 0x1b1   :  { %v2137_v0 = vsub.s32 %v2134_v11, %v3063_v63 }
 0x1b3   :  { %2074 = vmatpush1.bf16.msra.mxu0 %v2815_v35 }
 0x1b4   :  { %2075 = vmatprep.subr.bf16.mxu0 %v2820_v28 }
 0x1b7   :  { %2076 = vmatpush1.bf16.msra.mxu0 %v2818_v8 }
 0x1b8   :  { %2077 = vmatprep.subr.bf16.mxu0 %v2823_v29 }
 0x1bb   :  { %2078 = vmatpush1.bf16.msra.mxu0 %v2821_v30 }
 0x1bc   :  { %2079 = vmatprep.subr.bf16.mxu0 %v2826_v31 }
 0x1bf   :  { %2080 = vmatpush1.bf16.msra.mxu0 %v2824_v52 }
 0x1c0   :  { %2081 = vmatprep.subr.bf16.mxu0 %v2829_v32 }
 0x1c3   :  { %2082 = vmatpush1.bf16.msra.mxu0 %v2827_v33 }
 0x1c4   :  { %2083 = vmatprep.subr.bf16.mxu0 %v2832_v34 }
 0x1c7   :  { %2084 = vmatpush1.bf16.msra.mxu0 %v2830_v36 }
 0x1c8   :  { %2085 = vmatprep.subr.bf16.mxu0 %v2835_v37 }
 0x1cb   :  { %2086 = vmatpush1.bf16.msra.mxu0 %v2833_v38 }
 0x1cc   :  { %2087 = vmatprep.subr.bf16.mxu0 %v2838_v39 }
 0x1cf   :  { %2088 = vmatpush1.bf16.msra.mxu0 %v2836_v40 }
 0x1d0   :  { %2089 = vmatprep.subr.bf16.mxu0 %v2841_v41 }
 0x1d3   :  { %2090 = vmatpush1.bf16.msra.mxu0 %v2839_v42 }
 0x1d4   :  { %2091 = vmatprep.subr.bf16.mxu0 %v2844_v43 }
 0x1d7   :  { %2092 = vmatpush1.bf16.msra.mxu0 %v2842_v44 }
 0x1d8   :  { %2093 = vmatprep.subr.bf16.mxu0 %v2847_v45 }
 0x1db   :  { %2094 = vmatpush1.bf16.msra.mxu0 %v2845_v46 }
 0x1dc   :  { %2095 = vmatprep.subr.bf16.mxu0 %v2850_v47 }
 0x1df   :  { %2096 = vmatpush1.bf16.msra.mxu0 %v2848_v48 }
 0x217   :  { %v1605_v54 = vpop.f32.mrb[4].mxu1 }
 0x218   :  { %v2424_v55 = vadd.f32 %v1605_v54, %v291_v51  ;;  %v1607_v56 = vpop.f32.mrb[5].mxu1 }
 0x219   :  { %v2425_v57 = vadd.f32 %v1607_v56, %v295_v53  ;;  %v1609_v58 = vpop.f32.mrb[6].mxu1 }
 0x21a   :  { %vm1614_vm3 = vcmp.gt.f32.partialorder %v2424_v55, 0.0  ;;  %v1618_v59 = vmul.f32 0.2, %v2424_v55  ;;  %v1610_v60 = vpop.f32.mrb[7].mxu1 }
 0x21b   :  { %vm1615_vm4 = vcmp.gt.f32.partialorder %v2425_v57, 0.0  ;;  %v1619_v61 = vmul.f32 0.2, %v2425_v57 }
 0x21c   :  { %v1622_v27 = vsel %vm1614_vm3, %v2424_v55, %v1618_v59 }
 0x21d   :  { %v1623_v1 = vsel %vm1615_vm4, %v2425_v57, %v1619_v61  ;;  %v1626_v3 = vpack.c.bf16 %v1622_v27, %v1622_v27 }
 0x21e   :  { %v1627_v2 = vpack.c.bf16 %v1623_v1, %v1623_v1 }
 0x220   :  { %2097 = vmatprep.mubr.bf16.mxu0 %v1627_v2 }
 0x221   :  { %2098 = vmatmul.mubr.bf16.vlgmr.msra.gmra.mrb[4].mxu0 %v1626_v3 }
 0x2f4   :  { %v2099_v7 = vpop.f32.mrb[4].mxu0 }
 0x2f5   :  { %v2426_v9 = vadd.f32 %v2099_v7, %v1697_v4  ;;  %v2101_v10 = vpop.f32.mrb[5].mxu0 }
 0x2f6   :  { %v2427_v12 = vadd.f32 %v2101_v10, %v1701_v5  ;;  %v2103_v13 = vpop.f32.mrb[6].mxu0 }
 0x2f7   :  { %vm2106_vm5 = vcmp.gt.f32.partialorder %v2426_v9, 0.0  ;;  %v2108_v15 = vmul.f32 0.2, %v2426_v9  ;;  %v2104_v17 = vpop.f32.mrb[7].mxu0 }
 0x2f8   :  { %vm2107_vm6 = vcmp.gt.f32.partialorder %v2427_v12, 0.0  ;;  %v2109_v19 = vmul.f32 0.2, %v2427_v12 }
 0x2f9   :  { %v2110_v20 = vsel %vm2106_vm5, %v2426_v9, %v2108_v15 }
 0x2fa   :  { %v2111_v21 = vsel %vm2107_vm6, %v2427_v12, %v2109_v19  ;;  %v2124_v23 = vmul.f32 %v2117_v14, %v2110_v20 }
 0x2fb   :  { %v2125_v24 = vmul.f32 %v2121_v18, %v2111_v21 }
 0x2fd   :  { %v2126_v25 = vadd.f32 %v2125_v24, %v2124_v23 }
 0x2ff   :  { %2127 = vadd.xlane.f32.xlu0 %v2126_v25 }
 0x38c   :  { %v2128_v35 = vpop.xlane.xlu0 %2127 }
 0x38d   :  { %v2131_v22 = vadd.f32 %v2130_v26, %v2128_v35 }
 0x38f   :  { %v2138_v28 = vrot.slane %v2131_v22, %v2137_v0 }
 0x391   :  { %2141 = vst.msk [vmem:[#allocation9] sm:$0x1] %vm2140_vm7, %v2138_v28 }
 0x392   :  { %2928 = shalt.err (!%p2925_p0)
}
 0x393   :  { %s2929_s26 = scalar_lea.hbm %s3118_s7, 16 }
 0x394   :  { %p2930_p1 = scmp.ne.s32.totalorder %s3118_s7, %s2929_s26  ;;  %p2933_p2 = scmp.lt.u32.totalorder %s2929_s26, %s3118_s7 }
 0x396   :  { %p2935_p3 = pnand %p2933_p2, %p2930_p1 }
 0x398   :  { %2938 = shalt.err (!%p2935_p3)
}
 0x399   :  { %2151 = dma.vmem_to_hbm [thread:$0]  %s2149_s21, 16, %s3118_s7, [#allocation5]  }
 0x39a   :  { %2943 = dma.done.wait [#allocation5], 16  }
 0x39b   :  { %2944 = vsyncadd [#allocation5], 4294967280 }
 0x39c   :  { %2155 = vsyncpa [#allocation4], 1 }
 0x39d   :  { %2156 = vsyncpa [#allocation7], 1 }
 0x39e   :  { %2157 = vsyncpa [#allocation5], 1 }

</bundles_post_ra>
